<compile_context>
chip_gen: v7x
topology: tpu7x:2x2x1
jax: 0.10.0
libtpu: 0.0.40
codegen_flags: <defaults>
</compile_context>

<pallas_src>
import jax
import jax.numpy as jnp
from jax.experimental import pallas as pl
from jax.experimental.pallas import tpu as pltpu

IN_FEATURES = 768
OUT_FEATURES = 919
N_PAD = 1024          # 919 padded up to a multiple of 256 (clean MXU / lane tiling)
MAX_TB = 512          # max batch-tile rows (fits comfortably in scoped VMEM)


def _round_up(x, m):
    return (x + m - 1) // m * m


def _n_tiles_for_small_batch():
    """On v7x (2 TensorCores/chip) split N in half for latency-bound tiny
    batches so both cores pull disjoint weight halves; elsewhere keep 1."""
    try:
        kind = jax.devices()[0].device_kind.lower()
    except Exception:
        return 1
    return 2 if "v7" in kind else 1


def _linear_kernel(x_ref, wt_ref, b_ref, o_ref):
    # x_ref : (tb, 768)  f32  VMEM   (cast to bf16 here, on the VPU)
    # wt_ref: (768, tn)  bf16 VMEM   (resident: constant index_map)
    # b_ref : (1, tn)    f32  VMEM   (resident)
    # o_ref : (tb, tn)   f32  VMEM
    x_bf = x_ref[...].astype(jnp.bfloat16)
    acc = jnp.dot(x_bf, wt_ref[...], preferred_element_type=jnp.float32)
    o_ref[...] = acc + b_ref[...]


def prepare_params(weight, bias):
    """One-time parameter preparation (hoisted out of the forward path).

    weight: (919, 768) f32, bias: (919,) f32
    returns wt_padded: (768, 1024) bf16, bias_padded: (1, 1024) f32
    """
    wt = jnp.asarray(weight).T                                   # (768, 919)
    wt = jnp.pad(wt, ((0, 0), (0, N_PAD - OUT_FEATURES)))        # (768, 1024)
    wt = wt.astype(jnp.bfloat16)
    b2 = jnp.pad(jnp.asarray(bias), (0, N_PAD - OUT_FEATURES))
    b2 = b2.reshape(1, N_PAD).astype(jnp.float32)
    return wt, b2


def cls_classifier_forward(x, wt_padded, bias_padded):
    """x: (B, 768) f32; wt_padded: (768, 1024) bf16; bias_padded: (1, 1024) f32
    -> (B, 919) f32."""
    B = x.shape[0]

    # Batch tile: multiple of 8 (f32 sublane pack), capped at MAX_TB rows.
    tb = min(MAX_TB, _round_up(B, 8))
    b_pad = _round_up(B, tb)
    if b_pad != B:                      # only pad when actually needed
        x = jnp.pad(x, ((0, b_pad - B), (0, 0)))

    nb = b_pad // tb
    # N tiling: whole 1024 (weight resident, one step per batch tile), except
    # on v7x with a single batch tile where we split N across the two TCs.
    nn = _n_tiles_for_small_batch() if nb == 1 else 1
    tn = N_PAD // nn

    grid = (nb, nn)

    bytes_accessed = (b_pad * IN_FEATURES * 4        # f32 activations
                      + wt_padded.size * 2           # bf16 weights (read once)
                      + bias_padded.size * 4
                      + b_pad * N_PAD * 4)           # f32 output

    out = pl.pallas_call(
        _linear_kernel,
        out_shape=jax.ShapeDtypeStruct((b_pad, N_PAD), jnp.float32),
        grid_spec=pltpu.PrefetchScalarGridSpec(
            num_scalar_prefetch=0,
            grid=grid,
            in_specs=[
                # x tile: depends only on the batch index.
                pl.BlockSpec((tb, IN_FEATURES), lambda i, j: (i, 0)),
                # weight: constant block index when nn==1 -> fetched from HBM
                # exactly once and kept resident in VMEM across all batch
                # tiles; when nn==2 each N half is fetched once.
                pl.BlockSpec((IN_FEATURES, tn), lambda i, j: (0, j)),
                pl.BlockSpec((1, tn), lambda i, j: (0, j)),
            ],
            out_specs=pl.BlockSpec((tb, tn), lambda i, j: (i, j)),
        ),
        compiler_params=pltpu.CompilerParams(
            # No reduction grid axis (K=768 kept whole) -> both axes are
            # independent; "parallel" enables megacore sharding on v7x and is
            # measured-neutral on v5e/v6e.
            dimension_semantics=("parallel", "parallel"),
        ),
        cost_estimate=pl.CostEstimate(
            flops=2 * b_pad * IN_FEATURES * N_PAD,
            transcendentals=0,
            bytes_accessed=bytes_accessed,
        ),
    )(x, wt_padded, bias_padded)

    # Trim to the module's exact output shape (padded columns are exactly 0).
    # Consumers that can mask columns 919..1023 may take the padded slab
    # directly to avoid this extra XLA pass.
    return out[:B, :OUT_FEATURES]


def reference_forward(x, weight, bias):
    return x @ weight.T + bias


if __name__ == "__main__":
    key = jax.random.PRNGKey(0)
    k_x, k_w, k_b = jax.random.split(key, 3)

    # Small batch; feature dims are fixed by the module (768 -> 919).
    B = 8
    x = jax.random.normal(k_x, (B, IN_FEATURES), dtype=jnp.float32)

    # Deterministic parameter init (mimics nn.Linear uniform(-1/sqrt(in), 1/sqrt(in))).
    bound = 1.0 / (IN_FEATURES ** 0.5)
    weight = jax.random.uniform(
        k_w, (OUT_FEATURES, IN_FEATURES), dtype=jnp.float32,
        minval=-bound, maxval=bound)
    bias = jax.random.uniform(
        k_b, (OUT_FEATURES,), dtype=jnp.float32, minval=-bound, maxval=bound)

    # One-time parameter prep (transpose / pad / bf16 cast hoisted out of the
    # forward path).
    wt_padded, bias_padded = prepare_params(weight, bias)

    fwd = jax.jit(cls_classifier_forward)
    out = fwd(x, wt_padded, bias_padded)
    out = jax.block_until_ready(out)

    ref = reference_forward(x, weight, bias)
    assert out.shape == (B, OUT_FEATURES), out.shape
    # bf16 operands with f32 accumulation: tolerance loosened accordingly.
    assert jnp.allclose(out, ref, atol=2e-2, rtol=2e-2), \
        float(jnp.max(jnp.abs(out - ref)))

    print("KERNEL_OK")
</pallas_src>

<mosaic_0001>
module attributes {stable_mosaic.version = 11 : i64} {
  func.func @_linear_kernel(%arg0: i32, %arg1: i32, %arg2: memref<8x768xf32, #tpu.memory_space<vmem>>, %arg3: memref<768x1024xbf16, #tpu.memory_space<vmem>>, %arg4: memref<1x1024xf32, #tpu.memory_space<vmem>>, %arg5: memref<8x1024xf32, #tpu.memory_space<vmem>>) attributes {dimension_semantics = [#tpu.dimension_semantics<parallel>, #tpu.dimension_semantics<parallel>], iteration_bounds = array<i64: 1, 1>, scalar_prefetch = 0 : i64, scratch_operands = 0 : i64, tpu.core_type = #tpu.core_type<tc>, window_params = [{transform_indices = @transform_0, window_bounds = array<i64: 8, 768>}, {transform_indices = @transform_1, window_bounds = array<i64: 768, 1024>}, {transform_indices = @transform_2, window_bounds = array<i64: 1, 1024>}, {transform_indices = @transform_3, window_bounds = array<i64: 8, 1024>}]} {
    %c0 = arith.constant 0 : index
    %c0_0 = arith.constant 0 : index
    %0 = vector.load %arg2[%c0, %c0_0] : memref<8x768xf32, #tpu.memory_space<vmem>>, vector<8x768xf32>
    %1 = arith.truncf %0 : vector<8x768xf32> to vector<8x768xbf16>
    %c0_1 = arith.constant 0 : index
    %c0_2 = arith.constant 0 : index
    %2 = vector.load %arg3[%c0_1, %c0_2] : memref<768x1024xbf16, #tpu.memory_space<vmem>>, vector<768x1024xbf16>
    %cst = arith.constant dense<0.000000e+00> : vector<8x1024xf32>
    %3 = tpu.matmul %1, %2, %cst {dimension_numbers = #tpu.dot_dimension_numbers<[1], [0], [0], [1], [0, 0, 1, 1], [], []>} : vector<8x768xbf16>, vector<768x1024xbf16>, vector<8x1024xf32> -> vector<8x1024xf32>
    %c0_3 = arith.constant 0 : index
    %c0_4 = arith.constant 0 : index
    %4 = vector.load %arg4[%c0_3, %c0_4] : memref<1x1024xf32, #tpu.memory_space<vmem>>, vector<1x1024xf32>
    %5 = vector.broadcast %4 : vector<1x1024xf32> to vector<8x1024xf32>
    %6 = arith.addf %3, %5 : vector<8x1024xf32>
    %c0_5 = arith.constant 0 : index
    %c0_6 = arith.constant 0 : index
    %7 = vector.load %arg5[%c0_5, %c0_6] : memref<8x1024xf32, #tpu.memory_space<vmem>>, vector<8x1024xf32>
    tpu.vector_store %arg5[%c0_5, %c0_6], %6 {strides = array<i32>} : memref<8x1024xf32, #tpu.memory_space<vmem>>, vector<8x1024xf32>,
    return
  }
  func.func @transform_0(%arg0: i32, %arg1: i32) -> (i32, i32) {
    %c0_i32 = arith.constant 0 : i32
    %c0_i32_0 = arith.constant 0 : i32
    return %arg0, %c0_i32 : i32, i32
  }
  func.func @transform_1(%arg0: i32, %arg1: i32) -> (i32, i32) {
    %c0_i32 = arith.constant 0 : i32
    %c0_i32_0 = arith.constant 0 : i32
    return %c0_i32, %arg1 : i32, i32
  }
  func.func @transform_2(%arg0: i32, %arg1: i32) -> (i32, i32) {
    %c0_i32 = arith.constant 0 : i32
    %c0_i32_0 = arith.constant 0 : i32
    return %c0_i32, %arg1 : i32, i32
  }
  func.func @transform_3(%arg0: i32, %arg1: i32) -> (i32, i32) {
    %c0_i32 = arith.constant 0 : i32
    return %arg0, %arg1 : i32, i32
  }
}

</mosaic_0001>

<bundles_post_ra>
// kernel: cls_classifier_forward.1
= control target key start
LH: loop header
LB: loop body
LE: loop exit
PB: predicated region body
PF: predicated region fallthrough
CT: control target
= control target key end

     0   :  { %8 = vsyncpa [#allocation3], 0  ;;  %s3560_s0 = inlined_call_operand.hbm [shape: f32[8,768], index: 0, kind: input, shape index: {}]   ;;  %s3561_s1 = inlined_call_operand.hbm [shape: bf16[768,1024], index: 1, kind: input, shape index: {}]   ;;  %s3562_s2 = inlined_call_operand.hbm [shape: f32[1,1024], index: 2, kind: input, shape index: {}]   ;;  %s3563_s3 = inlined_call_operand.hbm [shape: f32[8,1024], index: 3, kind: output, shape index: {}]  }
   0x1   :  { %9 = vsyncpa [#allocation6], 0 }
   0x2   :  { %10 = vsyncpa [#allocation4], 0  ;;  %s3450_s12 = smov [#allocation5]   ;;  %s3356_s16 = scalar_lea.hbm %s3561_s1, 49152 }
   0x3   :  { %s26_s13 = sshll.u32 %s3450_s12, 4  ;;  %p3357_p0 = scmp.ne.s32.totalorder %s3561_s1, %s3356_s16  ;;  %s27_s13 = int_to_ptr.vmem [resolvable:$true] %s26_s13 }
   0x4   :  { %p3360_p1 = scmp.lt.u32.totalorder %s3356_s16, %s3561_s1 }
   0x6   :  { %p3362_p2 = pnand %p3360_p1, %p3357_p0 }
   0x8   :  { %3365 = shalt.err (!%p3362_p2)
}
   0x9   :  { %s3366_s21 = scalar_lea.vmem %s27_s13, 49152  ;;  %p3371_p4 = scmp.lt.s32.totalorder %s27_s13, %s27_s13 }
   0xa   :  { %p3367_p3 = scmp.ne.s32.totalorder %s27_s13, %s3366_s21  ;;  %p3372_p5 = scmp.lt.s32.totalorder %s3366_s21, %s3366_s21 }
   0xc   :  { %p3373_p6 = por %p3372_p5, %p3371_p4 }
   0xe   :  { %p3374_p7 = pnand %p3373_p6, %p3367_p3 }
  0x10   :  { %3377 = shalt.err (!%p3374_p7)
}
  0x11   :  { %s3451_s22 = smov 512   ;;  %s3452_s23 = smov 32  }
  0x12   :  { %32 = dma.hbm_to_vmem [thread:$0]  %s3561_s1, 49152, %s27_s13, [#allocation6], %s3451_s22, %s3451_s22, %s3452_s23  }
  0x13   :  { %s3453_s26 = smov [#allocation2]   ;;  %s3454_s28 = smov [#allocation7]  }
  0x14   :  { %s17_s27 = sshll.u32 %s3453_s26, 4  ;;  %s39_s29 = sshll.u32 %s3454_s28, 4  ;;  %s18_s27 = int_to_ptr.vmem [resolvable:$true] %s17_s27  ;;  %s40_s29 = int_to_ptr.vmem [resolvable:$true] %s39_s29 }
  0x15   :  { %s3378_s5 = scalar_lea.hbm %s3560_s0, 768 }
  0x16   :  { %p3379_p8 = scmp.ne.s32.totalorder %s3560_s0, %s3378_s5  ;;  %p3382_p9 = scmp.lt.u32.totalorder %s3378_s5, %s3560_s0 }
  0x18   :  { %p3384_p10 = pnand %p3382_p9, %p3379_p8 }
  0x1a   :  { %3387 = shalt.err (!%p3384_p10)
}
  0x1b   :  { %s3388_s1 = scalar_lea.vmem %s18_s27, 768  ;;  %p3393_p12 = scmp.lt.s32.totalorder %s18_s27, %s18_s27 }
  0x1c   :  { %p3389_p11 = scmp.ne.s32.totalorder %s18_s27, %s3388_s1  ;;  %p3394_p13 = scmp.lt.s32.totalorder %s3388_s1, %s3388_s1 }
  0x1e   :  { %p3395_p0 = por %p3394_p13, %p3393_p12 }
  0x20   :  { %p3396_p1 = pnand %p3395_p0, %p3389_p11 }
  0x22   :  { %3399 = shalt.err (!%p3396_p1)
}
  0x23   :  { %20 = dma.hbm_to_vmem [thread:$0]  %s3560_s0, 768, %s18_s27, [#allocation3]  }
  0x24   :  { %s3400_s14 = scalar_lea.hbm %s3562_s2, 128 }
  0x25   :  { %p3401_p2 = scmp.ne.s32.totalorder %s3562_s2, %s3400_s14  ;;  %p3404_p3 = scmp.lt.u32.totalorder %s3400_s14, %s3562_s2 }
  0x27   :  { %p3406_p4 = pnand %p3404_p3, %p3401_p2 }
  0x29   :  { %3409 = shalt.err (!%p3406_p4)
}
  0x2a   :  { %s3410_s19 = scalar_lea.vmem %s40_s29, 128  ;;  %p3415_p6 = scmp.lt.s32.totalorder %s40_s29, %s40_s29 }
  0x2b   :  { %p3411_p5 = scmp.ne.s32.totalorder %s40_s29, %s3410_s19  ;;  %p3416_p7 = scmp.lt.s32.totalorder %s3410_s19, %s3410_s19 }
  0x2d   :  { %p3417_p8 = por %p3416_p7, %p3415_p6 }
  0x2f   :  { %p3418_p9 = pnand %p3417_p8, %p3411_p5 }
  0x31   :  { %3421 = shalt.err (!%p3418_p9)
}
  0x32   :  { %42 = dma.hbm_to_vmem [thread:$0]  %s3562_s2, 128, %s40_s29, [#allocation6]  }
  0x33   :  { %3444 = dma.done.wait [#allocation3], 768  }
  0x34   :  { %3445 = vsyncadd [#allocation3], 4294966528 }
  0x35   :  { %3446 = dma.done.wait [#allocation6], 49280  }
  0x36   :  { %3447 = vsyncadd [#allocation6], 4294918016  ;;  %v64_v0 = vld [vmem:[#allocation5] sm:$0xff]  ;;  %v65_v2 = vld [vmem:[#allocation5 + $0x8] sm:$0xff]  ;;  %s3455_s2 = smov [#allocation8]  }
  0x37   :  { %v68_v1 = vld [vmem:[#allocation5 + $0x20] sm:$0xff]  ;;  %v69_v4 = vld [vmem:[#allocation5 + $0x28] sm:$0xff]  ;;  %v53_v53 = vld [vmem:[#allocation2 + $0x8] sm:$0xff]  ;;  %s2916_s21 = sshll.u32 %s3455_s2, 4  ;;  %s2917_s21 = int_to_ptr.vmem [resolvable:$true] %s2916_s21 }
  0x38   :  { %v2927_v3 = vcombine.high %v64_v0, %v68_v1  ;;  %v2926_v5 = vcombine.low %v64_v0, %v68_v1  ;;  %v72_v6 = vld [vmem:[#allocation5 + $0x40] sm:$0xff]  ;;  %v2929_v8 = vcombine.high %v65_v2, %v69_v4  ;;  %v2928_v9 = vcombine.low %v65_v2, %v69_v4  ;;  %v73_v11 = vld [vmem:[#allocation5 + $0x48] sm:$0xff]  ;;  %s3422_s22 = scalar_lea.vmem %s2917_s21, 1024  ;;  %p3427_p11 = scmp.lt.s32.totalorder %s2917_s21, %s2917_s21 }
  0x39   :  { %v76_v7 = vld [vmem:[#allocation5 + $0x60] sm:$0xff]  ;;  %v77_v12 = vld [vmem:[#allocation5 + $0x68] sm:$0xff]  ;;  %v3512_v57 = vpack.c.bf16 %v53_v53, %v53_v53  ;;  %p3423_p10 = scmp.ne.s32.totalorder %s2917_s21, %s3422_s22  ;;  %p3428_p12 = scmp.lt.s32.totalorder %s3422_s22, %s3422_s22 }
  0x3a   :  { %v2935_v10 = vcombine.high %v72_v6, %v76_v7  ;;  %v80_v13 = vld [vmem:[#allocation5 + $0x80] sm:$0xff]  ;;  %2410 = vmatprep.subr.bf16.mxu0 %v2927_v3  ;;  %v2937_v14 = vcombine.high %v73_v11, %v77_v12  ;;  %v81_v16 = vld [vmem:[#allocation5 + $0x88] sm:$0xff]  ;;  %2533 = vmatprep.subr.bf16.mxu1 %v2929_v8  ;;  %v2934_v18 = vcombine.low %v72_v6, %v76_v7 }
  0x3b   :  { %v84_v15 = vld [vmem:[#allocation5 + $0xa0] sm:$0xff]  ;;  %v85_v17 = vld [vmem:[#allocation5 + $0xa8] sm:$0xff]  ;;  %2411 = vmatpush1.bf16.msra.mxu0 %v2926_v5  ;;  %2534 = vmatpush1.bf16.msra.mxu1 %v2928_v9  ;;  %v2936_v19 = vcombine.low %v73_v11, %v77_v12  ;;  %p3429_p13 = por %p3428_p12, %p3427_p11 }
  0x3c   :  { %2412 = vmatprep.subr.bf16.mxu0 %v2935_v10  ;;  %v2943_v20 = vcombine.high %v80_v13, %v84_v15  ;;  %2535 = vmatprep.subr.bf16.mxu1 %v2937_v14  ;;  %v2945_v21 = vcombine.high %v81_v16, %v85_v17  ;;  %v88_v22 = vld [vmem:[#allocation5 + $0xc0] sm:$0xff]  ;;  %v89_v24 = vld [vmem:[#allocation5 + $0xc8] sm:$0xff]  ;;  %v2942_v26 = vcombine.low %v80_v13, %v84_v15 }
  0x3d   :  { %v92_v23 = vld [vmem:[#allocation5 + $0xe0] sm:$0xff]  ;;  %v93_v25 = vld [vmem:[#allocation5 + $0xe8] sm:$0xff]  ;;  %v2944_v27 = vcombine.low %v81_v16, %v85_v17  ;;  %2442 = vmatprep.mubr.bf16.mxu0 %v3512_v57  ;;  %2565 = vmatprep.mubr.bf16.mxu1 %v3512_v57  ;;  %p3430_p0 = pnand %p3429_p13, %p3423_p10 }
  0x3e   :  { %v2951_v28 = vcombine.high %v88_v22, %v92_v23  ;;  %v2953_v29 = vcombine.high %v89_v24, %v93_v25  ;;  %v96_v30 = vld [vmem:[#allocation5 + $0x100] sm:$0xff]  ;;  %v97_v32 = vld [vmem:[#allocation5 + $0x108] sm:$0xff]  ;;  %v2950_v34 = vcombine.low %v88_v22, %v92_v23  ;;  %v2952_v35 = vcombine.low %v89_v24, %v93_v25 }
  0x3f   :  { %2413 = vmatpush1.bf16.msra.mxu0 %v2934_v18  ;;  %2536 = vmatpush1.bf16.msra.mxu1 %v2936_v19  ;;  %v100_v31 = vld [vmem:[#allocation5 + $0x120] sm:$0xff]  ;;  %v101_v33 = vld [vmem:[#allocation5 + $0x128] sm:$0xff] }
  0x40   :  { %2414 = vmatprep.subr.bf16.mxu0 %v2943_v20  ;;  %2537 = vmatprep.subr.bf16.mxu1 %v2945_v21  ;;  %v2959_v36 = vcombine.high %v96_v30, %v100_v31  ;;  %v2961_v37 = vcombine.high %v97_v32, %v101_v33  ;;  %v104_v38 = vld [vmem:[#allocation5 + $0x140] sm:$0xff]  ;;  %v105_v40 = vld [vmem:[#allocation5 + $0x148] sm:$0xff]  ;;  %v2958_v42 = vcombine.low %v96_v30, %v100_v31 }
  0x41   :  { %v108_v39 = vld [vmem:[#allocation5 + $0x160] sm:$0xff]  ;;  %v109_v41 = vld [vmem:[#allocation5 + $0x168] sm:$0xff]  ;;  %v2960_v43 = vcombine.low %v97_v32, %v101_v33 }
  0x42   :  { %v2967_v44 = vcombine.high %v104_v38, %v108_v39  ;;  %v2969_v45 = vcombine.high %v105_v40, %v109_v41  ;;  %v112_v46 = vld [vmem:[#allocation5 + $0x180] sm:$0xff]  ;;  %v113_v48 = vld [vmem:[#allocation5 + $0x188] sm:$0xff]  ;;  %v2966_v50 = vcombine.low %v104_v38, %v108_v39  ;;  %v2968_v51 = vcombine.low %v105_v40, %v109_v41 }
  0x43   :  { %2415 = vmatpush1.bf16.msra.mxu0 %v2942_v26  ;;  %2538 = vmatpush1.bf16.msra.mxu1 %v2944_v27  ;;  %v116_v47 = vld [vmem:[#allocation5 + $0x1a0] sm:$0xff]  ;;  %v117_v49 = vld [vmem:[#allocation5 + $0x1a8] sm:$0xff] }
  0x44   :  { %2416 = vmatprep.subr.bf16.mxu0 %v2951_v28  ;;  %2539 = vmatprep.subr.bf16.mxu1 %v2953_v29  ;;  %v2975_v52 = vcombine.high %v112_v46, %v116_v47  ;;  %v2977_v54 = vcombine.high %v113_v48, %v117_v49  ;;  %v120_v55 = vld [vmem:[#allocation5 + $0x1c0] sm:$0xff]  ;;  %v121_v58 = vld [vmem:[#allocation5 + $0x1c8] sm:$0xff]  ;;  %v2974_v60 = vcombine.low %v112_v46, %v116_v47 }
  0x45   :  { %v124_v56 = vld [vmem:[#allocation5 + $0x1e0] sm:$0xff]  ;;  %v125_v59 = vld [vmem:[#allocation5 + $0x1e8] sm:$0xff]  ;;  %v2976_v61 = vcombine.low %v113_v48, %v117_v49 }
  0x46   :  { %v2983_v62 = vcombine.high %v120_v55, %v124_v56  ;;  %v2985_v63 = vcombine.high %v121_v58, %v125_v59  ;;  %v128_v0 = vld [vmem:[#allocation5 + $0x200] sm:$0xff]  ;;  %v129_v2 = vld [vmem:[#allocation5 + $0x208] sm:$0xff]  ;;  %v2982_v4 = vcombine.low %v120_v55, %v124_v56  ;;  %v2984_v5 = vcombine.low %v121_v58, %v125_v59 }
  0x47   :  { %2417 = vmatpush1.bf16.msra.mxu0 %v2950_v34  ;;  %2540 = vmatpush1.bf16.msra.mxu1 %v2952_v35  ;;  %v132_v1 = vld [vmem:[#allocation5 + $0x220] sm:$0xff]  ;;  %v133_v3 = vld [vmem:[#allocation5 + $0x228] sm:$0xff] }
  0x48   :  { %2418 = vmatprep.subr.bf16.mxu0 %v2959_v36  ;;  %2541 = vmatprep.subr.bf16.mxu1 %v2961_v37  ;;  %v2991_v6 = vcombine.high %v128_v0, %v132_v1  ;;  %v2993_v7 = vcombine.high %v129_v2, %v133_v3  ;;  %v136_v8 = vld [vmem:[#allocation5 + $0x240] sm:$0xff]  ;;  %v137_v10 = vld [vmem:[#allocation5 + $0x248] sm:$0xff]  ;;  %v2990_v12 = vcombine.low %v128_v0, %v132_v1 }
  0x49   :  { %v140_v9 = vld [vmem:[#allocation5 + $0x260] sm:$0xff]  ;;  %v141_v11 = vld [vmem:[#allocation5 + $0x268] sm:$0xff]  ;;  %v2992_v13 = vcombine.low %v129_v2, %v133_v3 }
  0x4a   :  { %v2999_v14 = vcombine.high %v136_v8, %v140_v9  ;;  %v3001_v15 = vcombine.high %v137_v10, %v141_v11  ;;  %v144_v16 = vld [vmem:[#allocation5 + $0x280] sm:$0xff]  ;;  %v145_v18 = vld [vmem:[#allocation5 + $0x288] sm:$0xff]  ;;  %v2998_v20 = vcombine.low %v136_v8, %v140_v9  ;;  %v3000_v21 = vcombine.low %v137_v10, %v141_v11 }
  0x4b   :  { %2419 = vmatpush1.bf16.msra.mxu0 %v2958_v42  ;;  %2542 = vmatpush1.bf16.msra.mxu1 %v2960_v43  ;;  %v148_v17 = vld [vmem:[#allocation5 + $0x2a0] sm:$0xff]  ;;  %v149_v19 = vld [vmem:[#allocation5 + $0x2a8] sm:$0xff] }
  0x4c   :  { %2420 = vmatprep.subr.bf16.mxu0 %v2967_v44  ;;  %2543 = vmatprep.subr.bf16.mxu1 %v2969_v45  ;;  %v3007_v22 = vcombine.high %v144_v16, %v148_v17  ;;  %v3009_v23 = vcombine.high %v145_v18, %v149_v19  ;;  %v152_v24 = vld [vmem:[#allocation5 + $0x2c0] sm:$0xff]  ;;  %v153_v26 = vld [vmem:[#allocation5 + $0x2c8] sm:$0xff]  ;;  %v3006_v28 = vcombine.low %v144_v16, %v148_v17 }
  0x4d   :  { %v156_v25 = vld [vmem:[#allocation5 + $0x2e0] sm:$0xff]  ;;  %v157_v27 = vld [vmem:[#allocation5 + $0x2e8] sm:$0xff]  ;;  %v3008_v29 = vcombine.low %v145_v18, %v149_v19 }
  0x4e   :  { %v3015_v30 = vcombine.high %v152_v24, %v156_v25  ;;  %v3017_v31 = vcombine.high %v153_v26, %v157_v27  ;;  %v160_v32 = vld [vmem:[#allocation5 + $0x300] sm:$0xff]  ;;  %v161_v34 = vld [vmem:[#allocation5 + $0x308] sm:$0xff]  ;;  %v3014_v36 = vcombine.low %v152_v24, %v156_v25  ;;  %v3016_v37 = vcombine.low %v153_v26, %v157_v27 }
  0x4f   :  { %2421 = vmatpush1.bf16.msra.mxu0 %v2966_v50  ;;  %2544 = vmatpush1.bf16.msra.mxu1 %v2968_v51  ;;  %v164_v33 = vld [vmem:[#allocation5 + $0x320] sm:$0xff]  ;;  %v165_v35 = vld [vmem:[#allocation5 + $0x328] sm:$0xff] }
  0x50   :  { %2422 = vmatprep.subr.bf16.mxu0 %v2975_v52  ;;  %2545 = vmatprep.subr.bf16.mxu1 %v2977_v54  ;;  %v3023_v38 = vcombine.high %v160_v32, %v164_v33  ;;  %v3025_v39 = vcombine.high %v161_v34, %v165_v35  ;;  %v168_v40 = vld [vmem:[#allocation5 + $0x340] sm:$0xff]  ;;  %v169_v42 = vld [vmem:[#allocation5 + $0x348] sm:$0xff]  ;;  %v3022_v44 = vcombine.low %v160_v32, %v164_v33 }
  0x51   :  { %v172_v41 = vld [vmem:[#allocation5 + $0x360] sm:$0xff]  ;;  %v173_v43 = vld [vmem:[#allocation5 + $0x368] sm:$0xff]  ;;  %v3024_v45 = vcombine.low %v161_v34, %v165_v35 }
  0x52   :  { %v3031_v46 = vcombine.high %v168_v40, %v172_v41  ;;  %v3033_v47 = vcombine.high %v169_v42, %v173_v43  ;;  %v176_v48 = vld [vmem:[#allocation5 + $0x380] sm:$0xff]  ;;  %v177_v50 = vld [vmem:[#allocation5 + $0x388] sm:$0xff]  ;;  %v3030_v52 = vcombine.low %v168_v40, %v172_v41  ;;  %v3032_v53 = vcombine.low %v169_v42, %v173_v43 }
  0x53   :  { %2423 = vmatpush1.bf16.msra.mxu0 %v2974_v60  ;;  %2546 = vmatpush1.bf16.msra.mxu1 %v2976_v61  ;;  %v180_v49 = vld [vmem:[#allocation5 + $0x3a0] sm:$0xff]  ;;  %v181_v51 = vld [vmem:[#allocation5 + $0x3a8] sm:$0xff] }
  0x54   :  { %2424 = vmatprep.subr.bf16.mxu0 %v2983_v62  ;;  %2547 = vmatprep.subr.bf16.mxu1 %v2985_v63  ;;  %v3039_v54 = vcombine.high %v176_v48, %v180_v49  ;;  %v3041_v55 = vcombine.high %v177_v50, %v181_v51  ;;  %v184_v56 = vld [vmem:[#allocation5 + $0x3c0] sm:$0xff]  ;;  %v185_v59 = vld [vmem:[#allocation5 + $0x3c8] sm:$0xff]  ;;  %v3038_v61 = vcombine.low %v176_v48, %v180_v49 }
  0x55   :  { %v188_v58 = vld [vmem:[#allocation5 + $0x3e0] sm:$0xff]  ;;  %v189_v60 = vld [vmem:[#allocation5 + $0x3e8] sm:$0xff]  ;;  %v3040_v62 = vcombine.low %v177_v50, %v181_v51 }
  0x56   :  { %v3047_v63 = vcombine.high %v184_v56, %v188_v58  ;;  %v3049_v0 = vcombine.high %v185_v59, %v189_v60  ;;  %v192_v1 = vld [vmem:[#allocation5 + $0x400] sm:$0xff]  ;;  %v193_v3 = vld [vmem:[#allocation5 + $0x408] sm:$0xff] }
  0x57   :  { %2425 = vmatpush1.bf16.msra.mxu0 %v2982_v4  ;;  %2548 = vmatpush1.bf16.msra.mxu1 %v2984_v5  ;;  %v196_v2 = vld [vmem:[#allocation5 + $0x420] sm:$0xff]  ;;  %v197_v4 = vld [vmem:[#allocation5 + $0x428] sm:$0xff]  ;;  %v3046_v5 = vcombine.low %v184_v56, %v188_v58 }
  0x58   :  { %2426 = vmatprep.subr.bf16.mxu0 %v2991_v6  ;;  %2549 = vmatprep.subr.bf16.mxu1 %v2993_v7  ;;  %v52_v6 = vld [vmem:[#allocation2] sm:$0xff]  ;;  %v3048_v7 = vcombine.low %v185_v59, %v189_v60  ;;  %v3055_v8 = vcombine.high %v192_v1, %v196_v2  ;;  %v3057_v9 = vcombine.high %v193_v3, %v197_v4  ;;  %v200_v10 = vld [vmem:[#allocation5 + $0x440] sm:$0xff]  ;;  %v213_v24 = vld [vmem:[#allocation5 + $0x4a8] sm:$0xff] }
  0x59   :  { %v204_v11 = vld [vmem:[#allocation5 + $0x460] sm:$0xff]  ;;  %v3054_v16 = vcombine.low %v192_v1, %v196_v2  ;;  %v3056_v17 = vcombine.low %v193_v3, %v197_v4  ;;  %v221_v32 = vld [vmem:[#allocation5 + $0x4e8] sm:$0xff] }
  0x5a   :  { %v3063_v18 = vcombine.high %v200_v10, %v204_v11  ;;  %v3062_v25 = vcombine.low %v200_v10, %v204_v11  ;;  %v229_v40 = vld [vmem:[#allocation5 + $0x528] sm:$0xff] }
  0x5b   :  { %2427 = vmatpush1.bf16.msra.mxu0 %v2990_v12  ;;  %2550 = vmatpush1.bf16.msra.mxu1 %v2992_v13  ;;  %v3516_v12 = vpack.c.bf16 %v52_v6, %v52_v6  ;;  %v201_v13 = vld [vmem:[#allocation5 + $0x448] sm:$0xff]  ;;  %v256_v6 = vld [vmem:[#allocation5 + $0x600] sm:$0xff] }
  0x5c   :  { %2428 = vmatprep.subr.bf16.mxu0 %v2999_v14  ;;  %2551 = vmatprep.subr.bf16.mxu1 %v3001_v15  ;;  %v205_v14 = vld [vmem:[#allocation5 + $0x468] sm:$0xff] }
  0x5d   :  { %v55_v15 = vld [vmem:[#allocation2 + $0x18] sm:$0xff]  ;;  %v3065_v19 = vcombine.high %v201_v13, %v205_v14  ;;  %v3064_v26 = vcombine.low %v201_v13, %v205_v14 }
  0x5e   :  { %v237_v48 = vld [vmem:[#allocation5 + $0x568] sm:$0xff] }
  0x5f   :  { %2429 = vmatpush1.bf16.msra.mxu0 %v2998_v20  ;;  %2552 = vmatpush1.bf16.msra.mxu1 %v3000_v21  ;;  %v208_v20 = vld [vmem:[#allocation5 + $0x480] sm:$0xff]  ;;  %v245_v56 = vld [vmem:[#allocation5 + $0x5a8] sm:$0xff] }
  0x60   :  { %2430 = vmatprep.subr.bf16.mxu0 %v3007_v22  ;;  %2553 = vmatprep.subr.bf16.mxu1 %v3009_v23  ;;  %v212_v21 = vld [vmem:[#allocation5 + $0x4a0] sm:$0xff]  ;;  %v3518_v22 = vpack.c.bf16 %v55_v15, %v55_v15  ;;  %v209_v23 = vld [vmem:[#allocation5 + $0x488] sm:$0xff] }
  0x61   :  { %v3071_v27 = vcombine.high %v208_v20, %v212_v21  ;;  %v3070_v33 = vcombine.low %v208_v20, %v212_v21  ;;  %v3072_v34 = vcombine.low %v209_v23, %v213_v24  ;;  %v253_v1 = vld [vmem:[#allocation5 + $0x5e8] sm:$0xff]  ;;  %v264_v15 = vld [vmem:[#allocation5 + $0x640] sm:$0xff] }
  0x63   :  { %2431 = vmatpush1.bf16.msra.mxu0 %v3006_v28  ;;  %2554 = vmatpush1.bf16.msra.mxu1 %v3008_v29  ;;  %v3073_v28 = vcombine.high %v209_v23, %v213_v24  ;;  %v216_v29 = vld [vmem:[#allocation5 + $0x4c0] sm:$0xff] }
  0x64   :  { %2432 = vmatprep.subr.bf16.mxu0 %v3015_v30  ;;  %2555 = vmatprep.subr.bf16.mxu1 %v3017_v31  ;;  %v220_v30 = vld [vmem:[#allocation5 + $0x4e0] sm:$0xff]  ;;  %v217_v31 = vld [vmem:[#allocation5 + $0x4c8] sm:$0xff] }
  0x65   :  { %v3079_v35 = vcombine.high %v216_v29, %v220_v30  ;;  %v3078_v41 = vcombine.low %v216_v29, %v220_v30  ;;  %v3080_v42 = vcombine.low %v217_v31, %v221_v32  ;;  %v272_v24 = vld [vmem:[#allocation5 + $0x680] sm:$0xff] }
  0x67   :  { %2433 = vmatpush1.bf16.msra.mxu0 %v3014_v36  ;;  %2556 = vmatpush1.bf16.msra.mxu1 %v3016_v37  ;;  %v3081_v36 = vcombine.high %v217_v31, %v221_v32  ;;  %v224_v37 = vld [vmem:[#allocation5 + $0x500] sm:$0xff] }
  0x68   :  { %2434 = vmatprep.subr.bf16.mxu0 %v3023_v38  ;;  %2557 = vmatprep.subr.bf16.mxu1 %v3025_v39  ;;  %v228_v38 = vld [vmem:[#allocation5 + $0x520] sm:$0xff]  ;;  %v225_v39 = vld [vmem:[#allocation5 + $0x508] sm:$0xff] }
  0x69   :  { %v3087_v43 = vcombine.high %v224_v37, %v228_v38  ;;  %v3086_v49 = vcombine.low %v224_v37, %v228_v38  ;;  %v3088_v50 = vcombine.low %v225_v39, %v229_v40  ;;  %v280_v32 = vld [vmem:[#allocation5 + $0x6c0] sm:$0xff] }
  0x6b   :  { %2435 = vmatpush1.bf16.msra.mxu0 %v3022_v44  ;;  %2558 = vmatpush1.bf16.msra.mxu1 %v3024_v45  ;;  %v3089_v44 = vcombine.high %v225_v39, %v229_v40  ;;  %v232_v45 = vld [vmem:[#allocation5 + $0x540] sm:$0xff] }
  0x6c   :  { %2436 = vmatprep.subr.bf16.mxu0 %v3031_v46  ;;  %2559 = vmatprep.subr.bf16.mxu1 %v3033_v47  ;;  %v236_v46 = vld [vmem:[#allocation5 + $0x560] sm:$0xff]  ;;  %v233_v47 = vld [vmem:[#allocation5 + $0x548] sm:$0xff] }
  0x6d   :  { %v3095_v51 = vcombine.high %v232_v45, %v236_v46  ;;  %v3094_v58 = vcombine.low %v232_v45, %v236_v46  ;;  %v3096_v59 = vcombine.low %v233_v47, %v237_v48  ;;  %v288_v40 = vld [vmem:[#allocation5 + $0x700] sm:$0xff] }
  0x6f   :  { %2437 = vmatpush1.bf16.msra.mxu0 %v3030_v52  ;;  %2560 = vmatpush1.bf16.msra.mxu1 %v3032_v53  ;;  %v3097_v52 = vcombine.high %v233_v47, %v237_v48  ;;  %v240_v53 = vld [vmem:[#allocation5 + $0x580] sm:$0xff] }
  0x70   :  { %2438 = vmatprep.subr.bf16.mxu0 %v3039_v54  ;;  %2561 = vmatprep.subr.bf16.mxu1 %v3041_v55  ;;  %v244_v54 = vld [vmem:[#allocation5 + $0x5a0] sm:$0xff]  ;;  %v241_v55 = vld [vmem:[#allocation5 + $0x588] sm:$0xff] }
  0x71   :  { %v3103_v60 = vcombine.high %v240_v53, %v244_v54  ;;  %v3102_v2 = vcombine.low %v240_v53, %v244_v54  ;;  %v3104_v3 = vcombine.low %v241_v55, %v245_v56  ;;  %v296_v48 = vld [vmem:[#allocation5 + $0x740] sm:$0xff] }
  0x73   :  { %2439 = vmatpush1.bf16.msra.mxu0 %v3038_v61  ;;  %2562 = vmatpush1.bf16.msra.mxu1 %v3040_v62  ;;  %v3105_v61 = vcombine.high %v241_v55, %v245_v56  ;;  %v248_v62 = vld [vmem:[#allocation5 + $0x5c0] sm:$0xff] }
  0x74   :  { %2440 = vmatprep.subr.bf16.mxu0 %v3047_v63  ;;  %2563 = vmatprep.subr.bf16.mxu1 %v3049_v0  ;;  %v252_v63 = vld [vmem:[#allocation5 + $0x5e0] sm:$0xff]  ;;  %v249_v0 = vld [vmem:[#allocation5 + $0x5c8] sm:$0xff] }
  0x75   :  { %v3111_v4 = vcombine.high %v248_v62, %v252_v63  ;;  %v3110_v10 = vcombine.low %v248_v62, %v252_v63  ;;  %v3112_v11 = vcombine.low %v249_v0, %v253_v1  ;;  %v304_v56 = vld [vmem:[#allocation5 + $0x780] sm:$0xff] }
  0x77   :  { %2441 = vmatpush1.bf16.msra.mxu0 %v3046_v5  ;;  %2564 = vmatpush1.bf16.msra.mxu1 %v3048_v7  ;;  %v3113_v5 = vcombine.high %v249_v0, %v253_v1  ;;  %v260_v7 = vld [vmem:[#allocation5 + $0x620] sm:$0xff] }
  0x78   :  { %2451 = vmatprep.subr.bf16.mxu0 %v3055_v8  ;;  %2574 = vmatprep.subr.bf16.mxu1 %v3057_v9  ;;  %v257_v8 = vld [vmem:[#allocation5 + $0x608] sm:$0xff]  ;;  %v3119_v13 = vcombine.high %v256_v6, %v260_v7  ;;  %v312_v1 = vld [vmem:[#allocation5 + $0x7c0] sm:$0xff] }
  0x79   :  { %v261_v9 = vld [vmem:[#allocation5 + $0x628] sm:$0xff] }
  0x7a   :  { %2443 = vmatmul.mubr.bf16.vlgmr.msra.gmra.mrb[0].mxu0 %v3516_v12  ;;  %2566 = vmatmul.mubr.bf16.vlgmr.msra.gmra.mrb[0].mxu1 %v3516_v12  ;;  %v3121_v14 = vcombine.high %v257_v8, %v261_v9  ;;  %v3120_v20 = vcombine.low %v257_v8, %v261_v9  ;;  %v320_v9 = vld [vmem:[#allocation5 + $0x800] sm:$0xff] }
  0x7b   :  { %2452 = vmatpush1.bf16.msra.mxu0 %v3054_v16  ;;  %2575 = vmatpush1.bf16.msra.mxu1 %v3056_v17  ;;  %v268_v16 = vld [vmem:[#allocation5 + $0x660] sm:$0xff]  ;;  %v265_v17 = vld [vmem:[#allocation5 + $0x648] sm:$0xff] }
  0x7c   :  { %2453 = vmatprep.subr.bf16.mxu0 %v3063_v18  ;;  %2576 = vmatprep.subr.bf16.mxu1 %v3065_v19  ;;  %v269_v18 = vld [vmem:[#allocation5 + $0x668] sm:$0xff]  ;;  %v3118_v19 = vcombine.low %v256_v6, %v260_v7  ;;  %v3127_v21 = vcombine.high %v264_v15, %v268_v16 }
  0x7d   :  { %2483 = vmatprep.mubr.bf16.mxu0 %v3518_v22  ;;  %2606 = vmatprep.mubr.bf16.mxu1 %v3518_v22  ;;  %v3129_v23 = vcombine.high %v265_v17, %v269_v18  ;;  %v3128_v29 = vcombine.low %v265_v17, %v269_v18 }
  0x7f   :  { %2454 = vmatpush1.bf16.msra.mxu0 %v3062_v25  ;;  %2577 = vmatpush1.bf16.msra.mxu1 %v3064_v26  ;;  %v276_v25 = vld [vmem:[#allocation5 + $0x6a0] sm:$0xff]  ;;  %v273_v26 = vld [vmem:[#allocation5 + $0x688] sm:$0xff] }
  0x80   :  { %2455 = vmatprep.subr.bf16.mxu0 %v3071_v27  ;;  %2578 = vmatprep.subr.bf16.mxu1 %v3073_v28  ;;  %v277_v27 = vld [vmem:[#allocation5 + $0x6a8] sm:$0xff]  ;;  %v3126_v28 = vcombine.low %v264_v15, %v268_v16  ;;  %v3135_v30 = vcombine.high %v272_v24, %v276_v25  ;;  %v54_v15 = vld [vmem:[#allocation2 + $0x10] sm:$0xff] }
  0x81   :  { %v3137_v31 = vcombine.high %v273_v26, %v277_v27  ;;  %v3136_v37 = vcombine.low %v273_v26, %v277_v27 }
  0x83   :  { %2456 = vmatpush1.bf16.msra.mxu0 %v3070_v33  ;;  %2579 = vmatpush1.bf16.msra.mxu1 %v3072_v34  ;;  %v284_v33 = vld [vmem:[#allocation5 + $0x6e0] sm:$0xff]  ;;  %v281_v34 = vld [vmem:[#allocation5 + $0x6c8] sm:$0xff] }
  0x84   :  { %2457 = vmatprep.subr.bf16.mxu0 %v3079_v35  ;;  %2580 = vmatprep.subr.bf16.mxu1 %v3081_v36  ;;  %v285_v35 = vld [vmem:[#allocation5 + $0x6e8] sm:$0xff]  ;;  %v3134_v36 = vcombine.low %v272_v24, %v276_v25  ;;  %v3143_v38 = vcombine.high %v280_v32, %v284_v33  ;;  %v57_v25 = vld [vmem:[#allocation2 + $0x28] sm:$0xff] }
  0x85   :  { %v3145_v39 = vcombine.high %v281_v34, %v285_v35  ;;  %v3144_v45 = vcombine.low %v281_v34, %v285_v35  ;;  %v333_v24 = vld [vmem:[#allocation5 + $0x868] sm:$0xff] }
  0x86   :  { %v341_v34 = vld [vmem:[#allocation5 + $0x8a8] sm:$0xff] }
  0x87   :  { %2458 = vmatpush1.bf16.msra.mxu0 %v3078_v41  ;;  %2581 = vmatpush1.bf16.msra.mxu1 %v3080_v42  ;;  %v292_v41 = vld [vmem:[#allocation5 + $0x720] sm:$0xff]  ;;  %v289_v42 = vld [vmem:[#allocation5 + $0x708] sm:$0xff] }
  0x88   :  { %2459 = vmatprep.subr.bf16.mxu0 %v3087_v43  ;;  %2582 = vmatprep.subr.bf16.mxu1 %v3089_v44  ;;  %v293_v43 = vld [vmem:[#allocation5 + $0x728] sm:$0xff]  ;;  %v3142_v44 = vcombine.low %v280_v32, %v284_v33  ;;  %v3151_v46 = vcombine.high %v288_v40, %v292_v41  ;;  %v3526_v32 = vpack.c.bf16 %v57_v25, %v57_v25 }
  0x89   :  { %v3153_v47 = vcombine.high %v289_v42, %v293_v43  ;;  %v3152_v53 = vcombine.low %v289_v42, %v293_v43  ;;  %v337_v33 = vld [vmem:[#allocation5 + $0x888] sm:$0xff] }
  0x8a   :  { %v349_v42 = vld [vmem:[#allocation5 + $0x8e8] sm:$0xff] }
  0x8b   :  { %2460 = vmatpush1.bf16.msra.mxu0 %v3086_v49  ;;  %2583 = vmatpush1.bf16.msra.mxu1 %v3088_v50  ;;  %v300_v49 = vld [vmem:[#allocation5 + $0x760] sm:$0xff]  ;;  %v297_v50 = vld [vmem:[#allocation5 + $0x748] sm:$0xff] }
  0x8c   :  { %2461 = vmatprep.subr.bf16.mxu0 %v3095_v51  ;;  %2584 = vmatprep.subr.bf16.mxu1 %v3097_v52  ;;  %v301_v51 = vld [vmem:[#allocation5 + $0x768] sm:$0xff]  ;;  %v3150_v52 = vcombine.low %v288_v40, %v292_v41  ;;  %v3159_v54 = vcombine.high %v296_v48, %v300_v49  ;;  %v348_v40 = vld [vmem:[#allocation5 + $0x8e0] sm:$0xff] }
  0x8d   :  { %v3161_v55 = vcombine.high %v297_v50, %v301_v51  ;;  %v3160_v62 = vcombine.low %v297_v50, %v301_v51  ;;  %v345_v41 = vld [vmem:[#allocation5 + $0x8c8] sm:$0xff] }
  0x8e   :  { %v357_v50 = vld [vmem:[#allocation5 + $0x928] sm:$0xff] }
  0x8f   :  { %2462 = vmatpush1.bf16.msra.mxu0 %v3094_v58  ;;  %2585 = vmatpush1.bf16.msra.mxu1 %v3096_v59  ;;  %v308_v58 = vld [vmem:[#allocation5 + $0x7a0] sm:$0xff]  ;;  %v305_v59 = vld [vmem:[#allocation5 + $0x788] sm:$0xff] }
  0x90   :  { %2463 = vmatprep.subr.bf16.mxu0 %v3103_v60  ;;  %2586 = vmatprep.subr.bf16.mxu1 %v3105_v61  ;;  %v309_v60 = vld [vmem:[#allocation5 + $0x7a8] sm:$0xff]  ;;  %v3158_v61 = vcombine.low %v296_v48, %v300_v49  ;;  %v3167_v63 = vcombine.high %v304_v56, %v308_v58  ;;  %v356_v48 = vld [vmem:[#allocation5 + $0x920] sm:$0xff] }
  0x91   :  { %v3169_v0 = vcombine.high %v305_v59, %v309_v60  ;;  %v3168_v6 = vcombine.low %v305_v59, %v309_v60  ;;  %v353_v49 = vld [vmem:[#allocation5 + $0x908] sm:$0xff] }
  0x92   :  { %v365_v59 = vld [vmem:[#allocation5 + $0x968] sm:$0xff] }
  0x93   :  { %2464 = vmatpush1.bf16.msra.mxu0 %v3102_v2  ;;  %2587 = vmatpush1.bf16.msra.mxu1 %v3104_v3  ;;  %v316_v2 = vld [vmem:[#allocation5 + $0x7e0] sm:$0xff]  ;;  %v313_v3 = vld [vmem:[#allocation5 + $0x7c8] sm:$0xff] }
  0x94   :  { %2465 = vmatprep.subr.bf16.mxu0 %v3111_v4  ;;  %2588 = vmatprep.subr.bf16.mxu1 %v3113_v5  ;;  %v317_v4 = vld [vmem:[#allocation5 + $0x7e8] sm:$0xff]  ;;  %v3166_v5 = vcombine.low %v304_v56, %v308_v58  ;;  %v3175_v7 = vcombine.high %v312_v1, %v316_v2  ;;  %v364_v56 = vld [vmem:[#allocation5 + $0x960] sm:$0xff] }
  0x95   :  { %v3177_v8 = vcombine.high %v313_v3, %v317_v4  ;;  %v3176_v16 = vcombine.low %v313_v3, %v317_v4  ;;  %v361_v58 = vld [vmem:[#allocation5 + $0x948] sm:$0xff] }
  0x96   :  { %v373_v3 = vld [vmem:[#allocation5 + $0x9a8] sm:$0xff] }
  0x97   :  { %2466 = vmatpush1.bf16.msra.mxu0 %v3110_v10  ;;  %2589 = vmatpush1.bf16.msra.mxu1 %v3112_v11  ;;  %v324_v10 = vld [vmem:[#allocation5 + $0x820] sm:$0xff]  ;;  %v321_v11 = vld [vmem:[#allocation5 + $0x808] sm:$0xff] }
  0x98   :  { %2467 = vmatprep.subr.bf16.mxu0 %v3119_v13  ;;  %2590 = vmatprep.subr.bf16.mxu1 %v3121_v14  ;;  %v325_v13 = vld [vmem:[#allocation5 + $0x828] sm:$0xff]  ;;  %v3174_v14 = vcombine.low %v312_v1, %v316_v2  ;;  %v3183_v17 = vcombine.high %v320_v9, %v324_v10  ;;  %v3182_v26 = vcombine.low %v320_v9, %v324_v10  ;;  %v372_v1 = vld [vmem:[#allocation5 + $0x9a0] sm:$0xff] }
  0x99   :  { %v3185_v18 = vcombine.high %v321_v11, %v325_v13  ;;  %v3184_v27 = vcombine.low %v321_v11, %v325_v13  ;;  %v369_v2 = vld [vmem:[#allocation5 + $0x988] sm:$0xff]  ;;  %v380_v9 = vld [vmem:[#allocation5 + $0x9e0] sm:$0xff] }
  0x9a   :  { %v377_v10 = vld [vmem:[#allocation5 + $0x9c8] sm:$0xff] }
  0x9b   :  { %2468 = vmatpush1.bf16.msra.mxu0 %v3118_v19  ;;  %2591 = vmatpush1.bf16.msra.mxu1 %v3120_v20  ;;  %v328_v19 = vld [vmem:[#allocation5 + $0x840] sm:$0xff]  ;;  %v381_v11 = vld [vmem:[#allocation5 + $0x9e8] sm:$0xff] }
  0x9c   :  { %2469 = vmatprep.subr.bf16.mxu0 %v3127_v21  ;;  %2592 = vmatprep.subr.bf16.mxu1 %v3129_v23  ;;  %v332_v20 = vld [vmem:[#allocation5 + $0x860] sm:$0xff]  ;;  %v3524_v21 = vpack.c.bf16 %v54_v15, %v54_v15  ;;  %v329_v23 = vld [vmem:[#allocation5 + $0x848] sm:$0xff] }
  0x9d   :  { %v3190_v35 = vcombine.low %v328_v19, %v332_v20 }
  0x9f   :  { %2470 = vmatpush1.bf16.msra.mxu0 %v3126_v28  ;;  %2593 = vmatpush1.bf16.msra.mxu1 %v3128_v29  ;;  %v3191_v28 = vcombine.high %v328_v19, %v332_v20  ;;  %v3193_v29 = vcombine.high %v329_v23, %v333_v24  ;;  %v385_v19 = vld [vmem:[#allocation5 + $0xa08] sm:$0xff] }
  0xa0   :  { %2471 = vmatprep.subr.bf16.mxu0 %v3135_v30  ;;  %2594 = vmatprep.subr.bf16.mxu1 %v3137_v31  ;;  %v336_v30 = vld [vmem:[#allocation5 + $0x880] sm:$0xff]  ;;  %v389_v20 = vld [vmem:[#allocation5 + $0xa28] sm:$0xff] }
  0xa1   :  { %v340_v31 = vld [vmem:[#allocation5 + $0x8a0] sm:$0xff] }
  0xa2   :  { %v3198_v43 = vcombine.low %v336_v30, %v340_v31 }
  0xa3   :  { %2472 = vmatpush1.bf16.msra.mxu0 %v3134_v36  ;;  %2595 = vmatpush1.bf16.msra.mxu1 %v3136_v37  ;;  %v3192_v36 = vcombine.low %v329_v23, %v333_v24  ;;  %v3199_v37 = vcombine.high %v336_v30, %v340_v31  ;;  %v3240_v24 = vcombine.low %v377_v10, %v381_v11  ;;  %v397_v30 = vld [vmem:[#allocation5 + $0xa68] sm:$0xff] }
  0xa4   :  { %2473 = vmatprep.subr.bf16.mxu0 %v3143_v38  ;;  %2596 = vmatprep.subr.bf16.mxu1 %v3145_v39  ;;  %v3201_v38 = vcombine.high %v337_v33, %v341_v34  ;;  %v344_v39 = vld [vmem:[#allocation5 + $0x8c0] sm:$0xff] }
  0xa5   :  { %v3206_v51 = vcombine.low %v344_v39, %v348_v40 }
  0xa7   :  { %2474 = vmatpush1.bf16.msra.mxu0 %v3142_v44  ;;  %2597 = vmatpush1.bf16.msra.mxu1 %v3144_v45  ;;  %v3200_v44 = vcombine.low %v337_v33, %v341_v34  ;;  %v3207_v45 = vcombine.high %v344_v39, %v348_v40  ;;  %v3248_v33 = vcombine.low %v385_v19, %v389_v20  ;;  %v405_v39 = vld [vmem:[#allocation5 + $0xaa8] sm:$0xff] }
  0xa8   :  { %2475 = vmatprep.subr.bf16.mxu0 %v3151_v46  ;;  %2598 = vmatprep.subr.bf16.mxu1 %v3153_v47  ;;  %v3209_v46 = vcombine.high %v345_v41, %v349_v42  ;;  %v352_v47 = vld [vmem:[#allocation5 + $0x900] sm:$0xff] }
  0xa9   :  { %v3214_v60 = vcombine.low %v352_v47, %v356_v48 }
  0xab   :  { %2476 = vmatpush1.bf16.msra.mxu0 %v3150_v52  ;;  %2599 = vmatpush1.bf16.msra.mxu1 %v3152_v53  ;;  %v3208_v52 = vcombine.low %v345_v41, %v349_v42  ;;  %v3215_v53 = vcombine.high %v352_v47, %v356_v48  ;;  %v413_v47 = vld [vmem:[#allocation5 + $0xae8] sm:$0xff] }
  0xac   :  { %2477 = vmatprep.subr.bf16.mxu0 %v3159_v54  ;;  %2600 = vmatprep.subr.bf16.mxu1 %v3161_v55  ;;  %v3217_v54 = vcombine.high %v353_v49, %v357_v50  ;;  %v360_v55 = vld [vmem:[#allocation5 + $0x940] sm:$0xff] }
  0xad   :  { %v3222_v4 = vcombine.low %v360_v55, %v364_v56 }
  0xaf   :  { %2478 = vmatpush1.bf16.msra.mxu0 %v3158_v61  ;;  %2601 = vmatpush1.bf16.msra.mxu1 %v3160_v62  ;;  %v3216_v61 = vcombine.low %v353_v49, %v357_v50  ;;  %v3223_v62 = vcombine.high %v360_v55, %v364_v56  ;;  %v421_v55 = vld [vmem:[#allocation5 + $0xb28] sm:$0xff] }
  0xb0   :  { %2479 = vmatprep.subr.bf16.mxu0 %v3167_v63  ;;  %2602 = vmatprep.subr.bf16.mxu1 %v3169_v0  ;;  %v3225_v63 = vcombine.high %v361_v58, %v365_v59  ;;  %v368_v0 = vld [vmem:[#allocation5 + $0x980] sm:$0xff] }
  0xb1   :  { %v3230_v13 = vcombine.low %v368_v0, %v372_v1 }
  0xb3   :  { %2480 = vmatpush1.bf16.msra.mxu0 %v3166_v5  ;;  %2603 = vmatpush1.bf16.msra.mxu1 %v3168_v6  ;;  %v3224_v5 = vcombine.low %v361_v58, %v365_v59  ;;  %v3231_v6 = vcombine.high %v368_v0, %v372_v1  ;;  %v429_v0 = vld [vmem:[#allocation5 + $0xb68] sm:$0xff] }
  0xb4   :  { %2481 = vmatprep.subr.bf16.mxu0 %v3175_v7  ;;  %2604 = vmatprep.subr.bf16.mxu1 %v3177_v8  ;;  %v3233_v7 = vcombine.high %v369_v2, %v373_v3  ;;  %v376_v8 = vld [vmem:[#allocation5 + $0x9c0] sm:$0xff] }
  0xb5   :  { %v3239_v15 = vcombine.high %v376_v8, %v380_v9  ;;  %v3238_v23 = vcombine.low %v376_v8, %v380_v9  ;;  %v437_v8 = vld [vmem:[#allocation5 + $0xba8] sm:$0xff] }
  0xb7   :  { %2482 = vmatpush1.bf16.msra.mxu0 %v3174_v14  ;;  %2605 = vmatpush1.bf16.msra.mxu1 %v3176_v16  ;;  %v3232_v14 = vcombine.low %v369_v2, %v373_v3  ;;  %v3241_v16 = vcombine.high %v377_v10, %v381_v11 }
  0xb8   :  { %2492 = vmatprep.subr.bf16.mxu0 %v3183_v17  ;;  %2615 = vmatprep.subr.bf16.mxu1 %v3185_v18  ;;  %v384_v17 = vld [vmem:[#allocation5 + $0xa00] sm:$0xff] }
  0xb9   :  { %v388_v18 = vld [vmem:[#allocation5 + $0xa20] sm:$0xff] }
  0xba   :  { %2484 = vmatmul.mubr.bf16.vlgmr.msra.gmra.mrb[0].mxu0 %v3524_v21  ;;  %2607 = vmatmul.mubr.bf16.vlgmr.msra.gmra.mrb[0].mxu1 %v3524_v21  ;;  %v3247_v25 = vcombine.high %v384_v17, %v388_v18  ;;  %v3246_v31 = vcombine.low %v384_v17, %v388_v18  ;;  %v445_v17 = vld [vmem:[#allocation5 + $0xbe8] sm:$0xff] }
  0xbb   :  { %2493 = vmatpush1.bf16.msra.mxu0 %v3182_v26  ;;  %2616 = vmatpush1.bf16.msra.mxu1 %v3184_v27  ;;  %v3249_v26 = vcombine.high %v385_v19, %v389_v20  ;;  %v392_v27 = vld [vmem:[#allocation5 + $0xa40] sm:$0xff] }
  0xbc   :  { %2494 = vmatprep.subr.bf16.mxu0 %v3191_v28  ;;  %2617 = vmatprep.subr.bf16.mxu1 %v3193_v29  ;;  %v396_v28 = vld [vmem:[#allocation5 + $0xa60] sm:$0xff]  ;;  %v393_v29 = vld [vmem:[#allocation5 + $0xa48] sm:$0xff] }
  0xbd   :  { %2524 = vmatprep.mubr.bf16.mxu0 %v3526_v32  ;;  %2647 = vmatprep.mubr.bf16.mxu1 %v3526_v32  ;;  %v3255_v34 = vcombine.high %v392_v27, %v396_v28  ;;  %v3254_v40 = vcombine.low %v392_v27, %v396_v28  ;;  %v3256_v41 = vcombine.low %v393_v29, %v397_v30  ;;  %v71_v27 = vld [vmem:[#allocation5 + $0x38] sm:$0xff] }
  0xbf   :  { %2495 = vmatpush1.bf16.msra.mxu0 %v3190_v35  ;;  %2618 = vmatpush1.bf16.msra.mxu1 %v3192_v36  ;;  %v3257_v35 = vcombine.high %v393_v29, %v397_v30  ;;  %v400_v36 = vld [vmem:[#allocation5 + $0xa80] sm:$0xff]  ;;  %v56_v29 = vld [vmem:[#allocation2 + $0x20] sm:$0xff] }
  0xc0   :  { %2496 = vmatprep.subr.bf16.mxu0 %v3199_v37  ;;  %2619 = vmatprep.subr.bf16.mxu1 %v3201_v38  ;;  %v404_v37 = vld [vmem:[#allocation5 + $0xaa0] sm:$0xff]  ;;  %v401_v38 = vld [vmem:[#allocation5 + $0xa88] sm:$0xff] }
  0xc1   :  { %v3263_v42 = vcombine.high %v400_v36, %v404_v37  ;;  %v3262_v48 = vcombine.low %v400_v36, %v404_v37  ;;  %v3264_v49 = vcombine.low %v401_v38, %v405_v39  ;;  %v3532_v36 = vpack.c.bf16 %v56_v29, %v56_v29  ;;  %v75_v37 = vld [vmem:[#allocation5 + $0x58] sm:$0xff] }
  0xc3   :  { %2497 = vmatpush1.bf16.msra.mxu0 %v3198_v43  ;;  %2620 = vmatpush1.bf16.msra.mxu1 %v3200_v44  ;;  %v3265_v43 = vcombine.high %v401_v38, %v405_v39  ;;  %v408_v44 = vld [vmem:[#allocation5 + $0xac0] sm:$0xff]  ;;  %v79_v38 = vld [vmem:[#allocation5 + $0x78] sm:$0xff] }
  0xc4   :  { %2498 = vmatprep.subr.bf16.mxu0 %v3207_v45  ;;  %2621 = vmatprep.subr.bf16.mxu1 %v3209_v46  ;;  %v412_v45 = vld [vmem:[#allocation5 + $0xae0] sm:$0xff]  ;;  %v409_v46 = vld [vmem:[#allocation5 + $0xac8] sm:$0xff] }
  0xc5   :  { %v3271_v50 = vcombine.high %v408_v44, %v412_v45  ;;  %v3270_v56 = vcombine.low %v408_v44, %v412_v45  ;;  %v3272_v58 = vcombine.low %v409_v46, %v413_v47  ;;  %v86_v44 = vld [vmem:[#allocation5 + $0xb0] sm:$0xff]  ;;  %v83_v45 = vld [vmem:[#allocation5 + $0x98] sm:$0xff] }
  0xc7   :  { %2499 = vmatpush1.bf16.msra.mxu0 %v3206_v51  ;;  %2622 = vmatpush1.bf16.msra.mxu1 %v3208_v52  ;;  %v3273_v51 = vcombine.high %v409_v46, %v413_v47  ;;  %v416_v52 = vld [vmem:[#allocation5 + $0xb00] sm:$0xff]  ;;  %v87_v46 = vld [vmem:[#allocation5 + $0xb8] sm:$0xff] }
  0xc8   :  { %2500 = vmatprep.subr.bf16.mxu0 %v3215_v53  ;;  %2623 = vmatprep.subr.bf16.mxu1 %v3217_v54  ;;  %v420_v53 = vld [vmem:[#allocation5 + $0xb20] sm:$0xff]  ;;  %v417_v54 = vld [vmem:[#allocation5 + $0xb08] sm:$0xff] }
  0xc9   :  { %v3279_v59 = vcombine.high %v416_v52, %v420_v53  ;;  %v3278_v1 = vcombine.low %v416_v52, %v420_v53  ;;  %v3280_v2 = vcombine.low %v417_v54, %v421_v55  ;;  %v94_v52 = vld [vmem:[#allocation5 + $0xf0] sm:$0xff]  ;;  %v91_v53 = vld [vmem:[#allocation5 + $0xd8] sm:$0xff] }
  0xcb   :  { %2501 = vmatpush1.bf16.msra.mxu0 %v3214_v60  ;;  %2624 = vmatpush1.bf16.msra.mxu1 %v3216_v61  ;;  %v3281_v60 = vcombine.high %v417_v54, %v421_v55  ;;  %v424_v61 = vld [vmem:[#allocation5 + $0xb40] sm:$0xff]  ;;  %v95_v54 = vld [vmem:[#allocation5 + $0xf8] sm:$0xff] }
  0xcc   :  { %2502 = vmatprep.subr.bf16.mxu0 %v3223_v62  ;;  %2625 = vmatprep.subr.bf16.mxu1 %v3225_v63  ;;  %v428_v62 = vld [vmem:[#allocation5 + $0xb60] sm:$0xff]  ;;  %v425_v63 = vld [vmem:[#allocation5 + $0xb48] sm:$0xff] }
  0xcd   :  { %v3287_v3 = vcombine.high %v424_v61, %v428_v62  ;;  %v3286_v9 = vcombine.low %v424_v61, %v428_v62  ;;  %v3288_v10 = vcombine.low %v425_v63, %v429_v0  ;;  %v102_v61 = vld [vmem:[#allocation5 + $0x130] sm:$0xff]  ;;  %v99_v62 = vld [vmem:[#allocation5 + $0x118] sm:$0xff] }
  0xcf   :  { %2503 = vmatpush1.bf16.msra.mxu0 %v3222_v4  ;;  %2626 = vmatpush1.bf16.msra.mxu1 %v3224_v5  ;;  %v3289_v4 = vcombine.high %v425_v63, %v429_v0  ;;  %v432_v5 = vld [vmem:[#allocation5 + $0xb80] sm:$0xff]  ;;  %v103_v63 = vld [vmem:[#allocation5 + $0x138] sm:$0xff] }
  0xd0   :  { %2504 = vmatprep.subr.bf16.mxu0 %v3231_v6  ;;  %2627 = vmatprep.subr.bf16.mxu1 %v3233_v7  ;;  %v436_v6 = vld [vmem:[#allocation5 + $0xba0] sm:$0xff]  ;;  %v433_v7 = vld [vmem:[#allocation5 + $0xb88] sm:$0xff] }
  0xd1   :  { %v3295_v11 = vcombine.high %v432_v5, %v436_v6  ;;  %v3294_v18 = vcombine.low %v432_v5, %v436_v6  ;;  %v3296_v19 = vcombine.low %v433_v7, %v437_v8  ;;  %v107_v5 = vld [vmem:[#allocation5 + $0x158] sm:$0xff] }
  0xd2   :  { %v111_v6 = vld [vmem:[#allocation5 + $0x178] sm:$0xff] }
  0xd3   :  { %2505 = vmatpush1.bf16.msra.mxu0 %v3230_v13  ;;  %2628 = vmatpush1.bf16.msra.mxu1 %v3232_v14  ;;  %v3297_v13 = vcombine.high %v433_v7, %v437_v8  ;;  %v440_v14 = vld [vmem:[#allocation5 + $0xbc0] sm:$0xff]  ;;  %v2964_v8 = vcombine.low %v99_v62, %v103_v63 }
  0xd4   :  { %2506 = vmatprep.subr.bf16.mxu0 %v3239_v15  ;;  %2629 = vmatprep.subr.bf16.mxu1 %v3241_v16  ;;  %v444_v15 = vld [vmem:[#allocation5 + $0xbe0] sm:$0xff]  ;;  %v441_v16 = vld [vmem:[#allocation5 + $0xbc8] sm:$0xff] }
  0xd5   :  { %v3303_v20 = vcombine.high %v440_v14, %v444_v15  ;;  %v3302_v28 = vcombine.low %v440_v14, %v444_v15  ;;  %v3304_v30 = vcombine.low %v441_v16, %v445_v17  ;;  %v115_v14 = vld [vmem:[#allocation5 + $0x198] sm:$0xff] }
  0xd6   :  { %v119_v15 = vld [vmem:[#allocation5 + $0x1b8] sm:$0xff] }
  0xd7   :  { %2507 = vmatpush1.bf16.msra.mxu0 %v3238_v23  ;;  %2630 = vmatpush1.bf16.msra.mxu1 %v3240_v24  ;;  %v3305_v23 = vcombine.high %v441_v16, %v445_v17  ;;  %v66_v24 = vld [vmem:[#allocation5 + $0x10] sm:$0xff]  ;;  %v2972_v17 = vcombine.low %v107_v5, %v111_v6 }
  0xd8   :  { %2508 = vmatprep.subr.bf16.mxu0 %v3247_v25  ;;  %2631 = vmatprep.subr.bf16.mxu1 %v3249_v26  ;;  %v70_v25 = vld [vmem:[#allocation5 + $0x30] sm:$0xff]  ;;  %v67_v26 = vld [vmem:[#allocation5 + $0x18] sm:$0xff] }
  0xd9   :  { %v2930_v39 = vcombine.low %v66_v24, %v70_v25 }
  0xdb   :  { %2509 = vmatpush1.bf16.msra.mxu0 %v3246_v31  ;;  %2632 = vmatpush1.bf16.msra.mxu1 %v3248_v33  ;;  %v2931_v31 = vcombine.high %v66_v24, %v70_v25  ;;  %v2933_v33 = vcombine.high %v67_v26, %v71_v27  ;;  %v123_v24 = vld [vmem:[#allocation5 + $0x1d8] sm:$0xff] }
  0xdc   :  { %2510 = vmatprep.subr.bf16.mxu0 %v3255_v34  ;;  %2633 = vmatprep.subr.bf16.mxu1 %v3257_v35  ;;  %v74_v34 = vld [vmem:[#allocation5 + $0x50] sm:$0xff]  ;;  %v127_v25 = vld [vmem:[#allocation5 + $0x1f8] sm:$0xff] }
  0xdd   :  { %v78_v35 = vld [vmem:[#allocation5 + $0x70] sm:$0xff]  ;;  %v2989_v29 = vcombine.high %v123_v24, %v127_v25 }
  0xde   :  { %v2938_v47 = vcombine.low %v74_v34, %v78_v35 }
  0xdf   :  { %2511 = vmatpush1.bf16.msra.mxu0 %v3254_v40  ;;  %2634 = vmatpush1.bf16.msra.mxu1 %v3256_v41  ;;  %v2932_v40 = vcombine.low %v67_v26, %v71_v27  ;;  %v2939_v41 = vcombine.high %v74_v34, %v78_v35  ;;  %v2980_v27 = vcombine.low %v115_v14, %v119_v15  ;;  %v135_v34 = vld [vmem:[#allocation5 + $0x238] sm:$0xff] }
  0xe0   :  { %2512 = vmatprep.subr.bf16.mxu0 %v3263_v42  ;;  %2635 = vmatprep.subr.bf16.mxu1 %v3265_v43  ;;  %v2941_v42 = vcombine.high %v75_v37, %v79_v38  ;;  %v82_v43 = vld [vmem:[#allocation5 + $0x90] sm:$0xff] }
  0xe1   :  { %v2946_v55 = vcombine.low %v82_v43, %v86_v44 }
  0xe3   :  { %2513 = vmatpush1.bf16.msra.mxu0 %v3262_v48  ;;  %2636 = vmatpush1.bf16.msra.mxu1 %v3264_v49  ;;  %v2940_v48 = vcombine.low %v75_v37, %v79_v38  ;;  %v2947_v49 = vcombine.high %v82_v43, %v86_v44  ;;  %v2988_v37 = vcombine.low %v123_v24, %v127_v25  ;;  %v143_v43 = vld [vmem:[#allocation5 + $0x278] sm:$0xff] }
  0xe4   :  { %2514 = vmatprep.subr.bf16.mxu0 %v3271_v50  ;;  %2637 = vmatprep.subr.bf16.mxu1 %v3273_v51  ;;  %v2949_v50 = vcombine.high %v83_v45, %v87_v46  ;;  %v90_v51 = vld [vmem:[#allocation5 + $0xd0] sm:$0xff] }
  0xe5   :  { %v2954_v0 = vcombine.low %v90_v51, %v94_v52 }
  0xe7   :  { %2515 = vmatpush1.bf16.msra.mxu0 %v3270_v56  ;;  %2638 = vmatpush1.bf16.msra.mxu1 %v3272_v58  ;;  %v2948_v56 = vcombine.low %v83_v45, %v87_v46  ;;  %v2955_v58 = vcombine.high %v90_v51, %v94_v52  ;;  %v151_v51 = vld [vmem:[#allocation5 + $0x2b8] sm:$0xff] }
  0xe8   :  { %2516 = vmatprep.subr.bf16.mxu0 %v3279_v59  ;;  %2639 = vmatprep.subr.bf16.mxu1 %v3281_v60  ;;  %v2957_v59 = vcombine.high %v91_v53, %v95_v54  ;;  %v98_v60 = vld [vmem:[#allocation5 + $0x110] sm:$0xff] }
  0xe9   :  { %v2962_v7 = vcombine.low %v98_v60, %v102_v61 }
  0xeb   :  { %2517 = vmatpush1.bf16.msra.mxu0 %v3278_v1  ;;  %2640 = vmatpush1.bf16.msra.mxu1 %v3280_v2  ;;  %v2956_v1 = vcombine.low %v91_v53, %v95_v54  ;;  %v2963_v2 = vcombine.high %v98_v60, %v102_v61  ;;  %v159_v60 = vld [vmem:[#allocation5 + $0x2f8] sm:$0xff] }
  0xec   :  { %2518 = vmatprep.subr.bf16.mxu0 %v3287_v3  ;;  %2641 = vmatprep.subr.bf16.mxu1 %v3289_v4  ;;  %v106_v3 = vld [vmem:[#allocation5 + $0x150] sm:$0xff] }
  0xed   :  { %v110_v4 = vld [vmem:[#allocation5 + $0x170] sm:$0xff] }
  0xee   :  { %v2970_v16 = vcombine.low %v106_v3, %v110_v4 }
  0xef   :  { %2519 = vmatpush1.bf16.msra.mxu0 %v3286_v9  ;;  %2642 = vmatpush1.bf16.msra.mxu1 %v3288_v10  ;;  %v2971_v9 = vcombine.high %v106_v3, %v110_v4  ;;  %v2973_v10 = vcombine.high %v107_v5, %v111_v6  ;;  %v167_v3 = vld [vmem:[#allocation5 + $0x338] sm:$0xff] }
  0xf0   :  { %2520 = vmatprep.subr.bf16.mxu0 %v3295_v11  ;;  %2643 = vmatprep.subr.bf16.mxu1 %v3297_v13  ;;  %v114_v11 = vld [vmem:[#allocation5 + $0x190] sm:$0xff] }
  0xf1   :  { %v118_v13 = vld [vmem:[#allocation5 + $0x1b0] sm:$0xff] }
  0xf2   :  { %v2978_v26 = vcombine.low %v114_v11, %v118_v13 }
  0xf3   :  { %2521 = vmatpush1.bf16.msra.mxu0 %v3294_v18  ;;  %2644 = vmatpush1.bf16.msra.mxu1 %v3296_v19  ;;  %v2979_v18 = vcombine.high %v114_v11, %v118_v13  ;;  %v2981_v19 = vcombine.high %v115_v14, %v119_v15  ;;  %v175_v11 = vld [vmem:[#allocation5 + $0x378] sm:$0xff] }
  0xf4   :  { %2522 = vmatprep.subr.bf16.mxu0 %v3303_v20  ;;  %2645 = vmatprep.subr.bf16.mxu1 %v3305_v23  ;;  %v122_v20 = vld [vmem:[#allocation5 + $0x1d0] sm:$0xff] }
  0xf5   :  { %v126_v23 = vld [vmem:[#allocation5 + $0x1f0] sm:$0xff] }
  0xf6   :  { %v2986_v35 = vcombine.low %v122_v20, %v126_v23 }
  0xf7   :  { %2523 = vmatpush1.bf16.msra.mxu0 %v3302_v28  ;;  %2646 = vmatpush1.bf16.msra.mxu1 %v3304_v30  ;;  %v2987_v28 = vcombine.high %v122_v20, %v126_v23  ;;  %v130_v30 = vld [vmem:[#allocation5 + $0x210] sm:$0xff]  ;;  %v183_v20 = vld [vmem:[#allocation5 + $0x3b8] sm:$0xff] }
  0xf8   :  { %2656 = vmatprep.subr.bf16.mxu0 %v2931_v31  ;;  %2779 = vmatprep.subr.bf16.mxu1 %v2933_v33  ;;  %v134_v31 = vld [vmem:[#allocation5 + $0x230] sm:$0xff]  ;;  %v131_v33 = vld [vmem:[#allocation5 + $0x218] sm:$0xff] }
  0xf9   :  { %v2995_v38 = vcombine.high %v130_v30, %v134_v31  ;;  %v2994_v44 = vcombine.low %v130_v30, %v134_v31  ;;  %v2996_v45 = vcombine.low %v131_v33, %v135_v34  ;;  %v191_v30 = vld [vmem:[#allocation5 + $0x3f8] sm:$0xff] }
  0xfa   :  { %2525 = vmatmul.mubr.bf16.vlgmr.msra.gmra.mrb[0].mxu0 %v3532_v36  ;;  %2648 = vmatmul.mubr.bf16.vlgmr.msra.gmra.mrb[0].mxu1 %v3532_v36 }
  0xfb   :  { %2657 = vmatpush1.bf16.msra.mxu0 %v2930_v39  ;;  %2780 = vmatpush1.bf16.msra.mxu1 %v2932_v40  ;;  %v2997_v39 = vcombine.high %v131_v33, %v135_v34  ;;  %v138_v40 = vld [vmem:[#allocation5 + $0x250] sm:$0xff] }
  0xfc   :  { %2658 = vmatprep.subr.bf16.mxu0 %v2939_v41  ;;  %2781 = vmatprep.subr.bf16.mxu1 %v2941_v42  ;;  %v142_v41 = vld [vmem:[#allocation5 + $0x270] sm:$0xff]  ;;  %v139_v42 = vld [vmem:[#allocation5 + $0x258] sm:$0xff] }
  0xfd   :  { %2688 = vmatprep.mubr.bf16.mxu0 %v3512_v57  ;;  %2811 = vmatprep.mubr.bf16.mxu1 %v3512_v57  ;;  %v2965_v57 = vcombine.high %v99_v62, %v103_v63  ;;  %v3003_v46 = vcombine.high %v138_v40, %v142_v41  ;;  %v3002_v52 = vcombine.low %v138_v40, %v142_v41  ;;  %v199_v40 = vld [vmem:[#allocation5 + $0x438] sm:$0xff] }
  0xfe   :  { %v3004_v53 = vcombine.low %v139_v42, %v143_v43 }
  0xff   :  { %2659 = vmatpush1.bf16.msra.mxu0 %v2938_v47  ;;  %2782 = vmatpush1.bf16.msra.mxu1 %v2940_v48  ;;  %v3005_v47 = vcombine.high %v139_v42, %v143_v43  ;;  %v146_v48 = vld [vmem:[#allocation5 + $0x290] sm:$0xff] }
 0x100   :  { %2660 = vmatprep.subr.bf16.mxu0 %v2947_v49  ;;  %2783 = vmatprep.subr.bf16.mxu1 %v2949_v50  ;;  %v150_v49 = vld [vmem:[#allocation5 + $0x2b0] sm:$0xff]  ;;  %v147_v50 = vld [vmem:[#allocation5 + $0x298] sm:$0xff] }
 0x101   :  { %v3011_v54 = vcombine.high %v146_v48, %v150_v49  ;;  %v3010_v61 = vcombine.low %v146_v48, %v150_v49  ;;  %v3012_v62 = vcombine.low %v147_v50, %v151_v51  ;;  %v207_v48 = vld [vmem:[#allocation5 + $0x478] sm:$0xff] }
 0x103   :  { %2661 = vmatpush1.bf16.msra.mxu0 %v2946_v55  ;;  %2784 = vmatpush1.bf16.msra.mxu1 %v2948_v56  ;;  %v3013_v55 = vcombine.high %v147_v50, %v151_v51  ;;  %v154_v56 = vld [vmem:[#allocation5 + $0x2d0] sm:$0xff] }
 0x104   :  { %2662 = vmatprep.subr.bf16.mxu0 %v2955_v58  ;;  %2785 = vmatprep.subr.bf16.mxu1 %v2957_v59  ;;  %v158_v58 = vld [vmem:[#allocation5 + $0x2f0] sm:$0xff]  ;;  %v155_v59 = vld [vmem:[#allocation5 + $0x2d8] sm:$0xff] }
 0x105   :  { %v3019_v63 = vcombine.high %v154_v56, %v158_v58  ;;  %v3018_v4 = vcombine.low %v154_v56, %v158_v58  ;;  %v3020_v5 = vcombine.low %v155_v59, %v159_v60  ;;  %v215_v56 = vld [vmem:[#allocation5 + $0x4b8] sm:$0xff] }
 0x107   :  { %2663 = vmatpush1.bf16.msra.mxu0 %v2954_v0  ;;  %2786 = vmatpush1.bf16.msra.mxu1 %v2956_v1  ;;  %v3021_v0 = vcombine.high %v155_v59, %v159_v60  ;;  %v162_v1 = vld [vmem:[#allocation5 + $0x310] sm:$0xff] }
 0x108   :  { %2664 = vmatprep.subr.bf16.mxu0 %v2963_v2  ;;  %2787 = vmatprep.subr.bf16.mxu1 %v2965_v57  ;;  %v166_v2 = vld [vmem:[#allocation5 + $0x330] sm:$0xff]  ;;  %v163_v57 = vld [vmem:[#allocation5 + $0x318] sm:$0xff] }
 0x109   :  { %v3027_v6 = vcombine.high %v162_v1, %v166_v2  ;;  %v3026_v13 = vcombine.low %v162_v1, %v166_v2  ;;  %v3028_v14 = vcombine.low %v163_v57, %v167_v3  ;;  %v223_v1 = vld [vmem:[#allocation5 + $0x4f8] sm:$0xff] }
 0x10b   :  { %2665 = vmatpush1.bf16.msra.mxu0 %v2962_v7  ;;  %2788 = vmatpush1.bf16.msra.mxu1 %v2964_v8  ;;  %v3029_v7 = vcombine.high %v163_v57, %v167_v3  ;;  %v170_v8 = vld [vmem:[#allocation5 + $0x350] sm:$0xff] }
 0x10c   :  { %2666 = vmatprep.subr.bf16.mxu0 %v2971_v9  ;;  %2789 = vmatprep.subr.bf16.mxu1 %v2973_v10  ;;  %v174_v9 = vld [vmem:[#allocation5 + $0x370] sm:$0xff]  ;;  %v171_v10 = vld [vmem:[#allocation5 + $0x358] sm:$0xff] }
 0x10d   :  { %v3035_v15 = vcombine.high %v170_v8, %v174_v9  ;;  %v3034_v23 = vcombine.low %v170_v8, %v174_v9  ;;  %v3036_v24 = vcombine.low %v171_v10, %v175_v11 }
 0x10f   :  { %2667 = vmatpush1.bf16.msra.mxu0 %v2970_v16  ;;  %2790 = vmatpush1.bf16.msra.mxu1 %v2972_v17  ;;  %v3037_v16 = vcombine.high %v171_v10, %v175_v11  ;;  %v178_v17 = vld [vmem:[#allocation5 + $0x390] sm:$0xff] }
 0x110   :  { %2668 = vmatprep.subr.bf16.mxu0 %v2979_v18  ;;  %2791 = vmatprep.subr.bf16.mxu1 %v2981_v19  ;;  %v182_v18 = vld [vmem:[#allocation5 + $0x3b0] sm:$0xff]  ;;  %v179_v19 = vld [vmem:[#allocation5 + $0x398] sm:$0xff] }
 0x111   :  { %v3043_v25 = vcombine.high %v178_v17, %v182_v18  ;;  %v3042_v31 = vcombine.low %v178_v17, %v182_v18  ;;  %v3044_v33 = vcombine.low %v179_v19, %v183_v20  ;;  %v234_v11 = vld [vmem:[#allocation5 + $0x550] sm:$0xff] }
 0x113   :  { %2669 = vmatpush1.bf16.msra.mxu0 %v2978_v26  ;;  %2792 = vmatpush1.bf16.msra.mxu1 %v2980_v27  ;;  %v3045_v26 = vcombine.high %v179_v19, %v183_v20  ;;  %v186_v27 = vld [vmem:[#allocation5 + $0x3d0] sm:$0xff] }
 0x114   :  { %2670 = vmatprep.subr.bf16.mxu0 %v2987_v28  ;;  %2793 = vmatprep.subr.bf16.mxu1 %v2989_v29  ;;  %v190_v28 = vld [vmem:[#allocation5 + $0x3f0] sm:$0xff]  ;;  %v187_v29 = vld [vmem:[#allocation5 + $0x3d8] sm:$0xff] }
 0x115   :  { %v3051_v34 = vcombine.high %v186_v27, %v190_v28  ;;  %v3050_v41 = vcombine.low %v186_v27, %v190_v28  ;;  %v3052_v42 = vcombine.low %v187_v29, %v191_v30  ;;  %v242_v20 = vld [vmem:[#allocation5 + $0x590] sm:$0xff] }
 0x117   :  { %2671 = vmatpush1.bf16.msra.mxu0 %v2986_v35  ;;  %2794 = vmatpush1.bf16.msra.mxu1 %v2988_v37  ;;  %v3053_v35 = vcombine.high %v187_v29, %v191_v30  ;;  %v194_v37 = vld [vmem:[#allocation5 + $0x410] sm:$0xff] }
 0x118   :  { %2672 = vmatprep.subr.bf16.mxu0 %v2995_v38  ;;  %2795 = vmatprep.subr.bf16.mxu1 %v2997_v39  ;;  %v198_v38 = vld [vmem:[#allocation5 + $0x430] sm:$0xff]  ;;  %v195_v39 = vld [vmem:[#allocation5 + $0x418] sm:$0xff] }
 0x119   :  { %v3059_v43 = vcombine.high %v194_v37, %v198_v38  ;;  %v3058_v49 = vcombine.low %v194_v37, %v198_v38  ;;  %v3060_v50 = vcombine.low %v195_v39, %v199_v40  ;;  %v250_v30 = vld [vmem:[#allocation5 + $0x5d0] sm:$0xff] }
 0x11b   :  { %2673 = vmatpush1.bf16.msra.mxu0 %v2994_v44  ;;  %2796 = vmatpush1.bf16.msra.mxu1 %v2996_v45  ;;  %v3061_v44 = vcombine.high %v195_v39, %v199_v40  ;;  %v202_v45 = vld [vmem:[#allocation5 + $0x450] sm:$0xff] }
 0x11c   :  { %2674 = vmatprep.subr.bf16.mxu0 %v3003_v46  ;;  %2797 = vmatprep.subr.bf16.mxu1 %v3005_v47  ;;  %v206_v46 = vld [vmem:[#allocation5 + $0x470] sm:$0xff]  ;;  %v203_v47 = vld [vmem:[#allocation5 + $0x458] sm:$0xff] }
 0x11d   :  { %v3067_v51 = vcombine.high %v202_v45, %v206_v46  ;;  %v3066_v58 = vcombine.low %v202_v45, %v206_v46  ;;  %v3068_v59 = vcombine.low %v203_v47, %v207_v48  ;;  %v258_v40 = vld [vmem:[#allocation5 + $0x610] sm:$0xff] }
 0x11f   :  { %2675 = vmatpush1.bf16.msra.mxu0 %v3002_v52  ;;  %2798 = vmatpush1.bf16.msra.mxu1 %v3004_v53  ;;  %v3069_v52 = vcombine.high %v203_v47, %v207_v48  ;;  %v210_v53 = vld [vmem:[#allocation5 + $0x490] sm:$0xff] }
 0x120   :  { %2676 = vmatprep.subr.bf16.mxu0 %v3011_v54  ;;  %2799 = vmatprep.subr.bf16.mxu1 %v3013_v55  ;;  %v214_v54 = vld [vmem:[#allocation5 + $0x4b0] sm:$0xff]  ;;  %v211_v55 = vld [vmem:[#allocation5 + $0x498] sm:$0xff] }
 0x121   :  { %v3075_v60 = vcombine.high %v210_v53, %v214_v54  ;;  %v3074_v2 = vcombine.low %v210_v53, %v214_v54  ;;  %v266_v48 = vld [vmem:[#allocation5 + $0x650] sm:$0xff] }
 0x123   :  { %2677 = vmatpush1.bf16.msra.mxu0 %v3010_v61  ;;  %2800 = vmatpush1.bf16.msra.mxu1 %v3012_v62  ;;  %v3077_v61 = vcombine.high %v211_v55, %v215_v56  ;;  %v218_v62 = vld [vmem:[#allocation5 + $0x4d0] sm:$0xff] }
 0x124   :  { %2678 = vmatprep.subr.bf16.mxu0 %v3019_v63  ;;  %2801 = vmatprep.subr.bf16.mxu1 %v3021_v0  ;;  %v222_v63 = vld [vmem:[#allocation5 + $0x4f0] sm:$0xff]  ;;  %v219_v0 = vld [vmem:[#allocation5 + $0x4d8] sm:$0xff] }
 0x125   :  { %v3083_v57 = vcombine.high %v218_v62, %v222_v63  ;;  %v3085_v3 = vcombine.high %v219_v0, %v223_v1  ;;  %v3082_v8 = vcombine.low %v218_v62, %v222_v63  ;;  %v3084_v9 = vcombine.low %v219_v0, %v223_v1  ;;  %v282_v1 = vld [vmem:[#allocation5 + $0x6d0] sm:$0xff] }
 0x127   :  { %2679 = vmatpush1.bf16.msra.mxu0 %v3018_v4  ;;  %2802 = vmatpush1.bf16.msra.mxu1 %v3020_v5  ;;  %v226_v4 = vld [vmem:[#allocation5 + $0x510] sm:$0xff] }
 0x128   :  { %2680 = vmatprep.subr.bf16.mxu0 %v3027_v6  ;;  %2803 = vmatprep.subr.bf16.mxu1 %v3029_v7  ;;  %v230_v5 = vld [vmem:[#allocation5 + $0x530] sm:$0xff]  ;;  %v227_v6 = vld [vmem:[#allocation5 + $0x518] sm:$0xff] }
 0x129   :  { %v231_v7 = vld [vmem:[#allocation5 + $0x538] sm:$0xff]  ;;  %v3091_v10 = vcombine.high %v226_v4, %v230_v5 }
 0x12a   :  { %v3092_v17 = vcombine.low %v227_v6, %v231_v7 }
 0x12b   :  { %2681 = vmatpush1.bf16.msra.mxu0 %v3026_v13  ;;  %2804 = vmatpush1.bf16.msra.mxu1 %v3028_v14  ;;  %v238_v13 = vld [vmem:[#allocation5 + $0x570] sm:$0xff]  ;;  %v235_v14 = vld [vmem:[#allocation5 + $0x558] sm:$0xff] }
 0x12c   :  { %2682 = vmatprep.subr.bf16.mxu0 %v3035_v15  ;;  %2805 = vmatprep.subr.bf16.mxu1 %v3037_v16  ;;  %v239_v15 = vld [vmem:[#allocation5 + $0x578] sm:$0xff]  ;;  %v3090_v16 = vcombine.low %v226_v4, %v230_v5  ;;  %v3099_v18 = vcombine.high %v234_v11, %v238_v13 }
 0x12d   :  { %v3101_v19 = vcombine.high %v235_v14, %v239_v15  ;;  %v3100_v27 = vcombine.low %v235_v14, %v239_v15  ;;  %v298_v15 = vld [vmem:[#allocation5 + $0x750] sm:$0xff] }
 0x12f   :  { %2683 = vmatpush1.bf16.msra.mxu0 %v3034_v23  ;;  %2806 = vmatpush1.bf16.msra.mxu1 %v3036_v24  ;;  %v246_v23 = vld [vmem:[#allocation5 + $0x5b0] sm:$0xff]  ;;  %v243_v24 = vld [vmem:[#allocation5 + $0x598] sm:$0xff] }
 0x130   :  { %2684 = vmatprep.subr.bf16.mxu0 %v3043_v25  ;;  %2807 = vmatprep.subr.bf16.mxu1 %v3045_v26  ;;  %v247_v25 = vld [vmem:[#allocation5 + $0x5b8] sm:$0xff]  ;;  %v3098_v26 = vcombine.low %v234_v11, %v238_v13  ;;  %v3107_v28 = vcombine.high %v242_v20, %v246_v23 }
 0x131   :  { %v3109_v29 = vcombine.high %v243_v24, %v247_v25  ;;  %v3108_v37 = vcombine.low %v243_v24, %v247_v25  ;;  %v306_v25 = vld [vmem:[#allocation5 + $0x790] sm:$0xff] }
 0x133   :  { %2685 = vmatpush1.bf16.msra.mxu0 %v3042_v31  ;;  %2808 = vmatpush1.bf16.msra.mxu1 %v3044_v33  ;;  %v254_v31 = vld [vmem:[#allocation5 + $0x5f0] sm:$0xff]  ;;  %v251_v33 = vld [vmem:[#allocation5 + $0x5d8] sm:$0xff] }
 0x134   :  { %2686 = vmatprep.subr.bf16.mxu0 %v3051_v34  ;;  %2809 = vmatprep.subr.bf16.mxu1 %v3053_v35  ;;  %v255_v34 = vld [vmem:[#allocation5 + $0x5f8] sm:$0xff]  ;;  %v3106_v35 = vcombine.low %v242_v20, %v246_v23  ;;  %v3115_v38 = vcombine.high %v250_v30, %v254_v31 }
 0x135   :  { %v3117_v39 = vcombine.high %v251_v33, %v255_v34  ;;  %v3116_v45 = vcombine.low %v251_v33, %v255_v34  ;;  %v314_v34 = vld [vmem:[#allocation5 + $0x7d0] sm:$0xff] }
 0x137   :  { %2687 = vmatpush1.bf16.msra.mxu0 %v3050_v41  ;;  %2810 = vmatpush1.bf16.msra.mxu1 %v3052_v42  ;;  %v262_v41 = vld [vmem:[#allocation5 + $0x630] sm:$0xff]  ;;  %v259_v42 = vld [vmem:[#allocation5 + $0x618] sm:$0xff] }
 0x138   :  { %2697 = vmatprep.subr.bf16.mxu0 %v3059_v43  ;;  %2820 = vmatprep.subr.bf16.mxu1 %v3061_v44  ;;  %v263_v43 = vld [vmem:[#allocation5 + $0x638] sm:$0xff]  ;;  %v3114_v44 = vcombine.low %v250_v30, %v254_v31  ;;  %v3123_v46 = vcombine.high %v258_v40, %v262_v41 }
 0x139   :  { %v3125_v47 = vcombine.high %v259_v42, %v263_v43  ;;  %v3124_v53 = vcombine.low %v259_v42, %v263_v43  ;;  %v322_v43 = vld [vmem:[#allocation5 + $0x810] sm:$0xff] }
 0x13a   :  { %2689 = vmatmul.mubr.bf16.vlgmr.msra.gmra.mrb[4].mxu0 %v3516_v12  ;;  %2812 = vmatmul.mubr.bf16.vlgmr.msra.gmra.mrb[4].mxu1 %v3516_v12  ;;  %v3076_v12 = vcombine.low %v211_v55, %v215_v56  ;;  %v274_v56 = vld [vmem:[#allocation5 + $0x690] sm:$0xff] }
 0x13b   :  { %2698 = vmatpush1.bf16.msra.mxu0 %v3058_v49  ;;  %2821 = vmatpush1.bf16.msra.mxu1 %v3060_v50  ;;  %v270_v49 = vld [vmem:[#allocation5 + $0x670] sm:$0xff]  ;;  %v267_v50 = vld [vmem:[#allocation5 + $0x658] sm:$0xff] }
 0x13c   :  { %2699 = vmatprep.subr.bf16.mxu0 %v3067_v51  ;;  %2822 = vmatprep.subr.bf16.mxu1 %v3069_v52  ;;  %v271_v51 = vld [vmem:[#allocation5 + $0x678] sm:$0xff]  ;;  %v3122_v52 = vcombine.low %v258_v40, %v262_v41  ;;  %v3131_v54 = vcombine.high %v266_v48, %v270_v49 }
 0x13d   :  { %2729 = vmatprep.mubr.bf16.mxu0 %v3518_v22  ;;  %2852 = vmatprep.mubr.bf16.mxu1 %v3518_v22  ;;  %v3093_v22 = vcombine.high %v227_v6, %v231_v7  ;;  %v3133_v55 = vcombine.high %v267_v50, %v271_v51  ;;  %v3132_v62 = vcombine.low %v267_v50, %v271_v51  ;;  %v290_v7 = vld [vmem:[#allocation5 + $0x710] sm:$0xff] }
 0x13e   :  { %v330_v51 = vld [vmem:[#allocation5 + $0x850] sm:$0xff] }
 0x13f   :  { %2700 = vmatpush1.bf16.msra.mxu0 %v3066_v58  ;;  %2823 = vmatpush1.bf16.msra.mxu1 %v3068_v59  ;;  %v278_v58 = vld [vmem:[#allocation5 + $0x6b0] sm:$0xff]  ;;  %v275_v59 = vld [vmem:[#allocation5 + $0x698] sm:$0xff] }
 0x140   :  { %2701 = vmatprep.subr.bf16.mxu0 %v3075_v60  ;;  %2824 = vmatprep.subr.bf16.mxu1 %v3077_v61  ;;  %v279_v60 = vld [vmem:[#allocation5 + $0x6b8] sm:$0xff]  ;;  %v3130_v61 = vcombine.low %v266_v48, %v270_v49  ;;  %v3139_v63 = vcombine.high %v274_v56, %v278_v58 }
 0x141   :  { %v3141_v0 = vcombine.high %v275_v59, %v279_v60  ;;  %v3140_v4 = vcombine.low %v275_v59, %v279_v60  ;;  %v338_v60 = vld [vmem:[#allocation5 + $0x890] sm:$0xff] }
 0x143   :  { %2702 = vmatpush1.bf16.msra.mxu0 %v3074_v2  ;;  %2825 = vmatpush1.bf16.msra.mxu1 %v3076_v12  ;;  %v286_v2 = vld [vmem:[#allocation5 + $0x6f0] sm:$0xff]  ;;  %v283_v12 = vld [vmem:[#allocation5 + $0x6d8] sm:$0xff] }
 0x144   :  { %2703 = vmatprep.subr.bf16.mxu0 %v3083_v57  ;;  %2826 = vmatprep.subr.bf16.mxu1 %v3085_v3  ;;  %v287_v57 = vld [vmem:[#allocation5 + $0x6f8] sm:$0xff]  ;;  %v3138_v3 = vcombine.low %v274_v56, %v278_v58  ;;  %v3147_v5 = vcombine.high %v282_v1, %v286_v2 }
 0x145   :  { %v3149_v6 = vcombine.high %v283_v12, %v287_v57  ;;  %v3148_v11 = vcombine.low %v283_v12, %v287_v57  ;;  %v346_v57 = vld [vmem:[#allocation5 + $0x8d0] sm:$0xff] }
 0x147   :  { %2704 = vmatpush1.bf16.msra.mxu0 %v3082_v8  ;;  %2827 = vmatpush1.bf16.msra.mxu1 %v3084_v9  ;;  %v294_v8 = vld [vmem:[#allocation5 + $0x730] sm:$0xff]  ;;  %v291_v9 = vld [vmem:[#allocation5 + $0x718] sm:$0xff] }
 0x148   :  { %2705 = vmatprep.subr.bf16.mxu0 %v3091_v10  ;;  %2828 = vmatprep.subr.bf16.mxu1 %v3093_v22  ;;  %v295_v10 = vld [vmem:[#allocation5 + $0x738] sm:$0xff]  ;;  %v3146_v22 = vcombine.low %v282_v1, %v286_v2  ;;  %v3155_v13 = vcombine.high %v290_v7, %v294_v8 }
 0x149   :  { %v3157_v14 = vcombine.high %v291_v9, %v295_v10  ;;  %v3156_v20 = vcombine.low %v291_v9, %v295_v10  ;;  %v354_v9 = vld [vmem:[#allocation5 + $0x910] sm:$0xff] }
 0x14a   :  { %v358_v10 = vld [vmem:[#allocation5 + $0x930] sm:$0xff] }
 0x14b   :  { %2706 = vmatpush1.bf16.msra.mxu0 %v3090_v16  ;;  %2829 = vmatpush1.bf16.msra.mxu1 %v3092_v17  ;;  %v302_v16 = vld [vmem:[#allocation5 + $0x770] sm:$0xff]  ;;  %v299_v17 = vld [vmem:[#allocation5 + $0x758] sm:$0xff] }
 0x14c   :  { %2707 = vmatprep.subr.bf16.mxu0 %v3099_v18  ;;  %2830 = vmatprep.subr.bf16.mxu1 %v3101_v19  ;;  %v303_v18 = vld [vmem:[#allocation5 + $0x778] sm:$0xff]  ;;  %v3154_v19 = vcombine.low %v290_v7, %v294_v8  ;;  %v3163_v23 = vcombine.high %v298_v15, %v302_v16 }
 0x14d   :  { %v3165_v24 = vcombine.high %v299_v17, %v303_v18  ;;  %v3164_v30 = vcombine.low %v299_v17, %v303_v18  ;;  %v366_v17 = vld [vmem:[#allocation5 + $0x970] sm:$0xff]  ;;  %v363_v18 = vld [vmem:[#allocation5 + $0x958] sm:$0xff] }
 0x14f   :  { %2708 = vmatpush1.bf16.msra.mxu0 %v3098_v26  ;;  %2831 = vmatpush1.bf16.msra.mxu1 %v3100_v27  ;;  %v310_v26 = vld [vmem:[#allocation5 + $0x7b0] sm:$0xff]  ;;  %v307_v27 = vld [vmem:[#allocation5 + $0x798] sm:$0xff] }
 0x150   :  { %2709 = vmatprep.subr.bf16.mxu0 %v3107_v28  ;;  %2832 = vmatprep.subr.bf16.mxu1 %v3109_v29  ;;  %v311_v28 = vld [vmem:[#allocation5 + $0x7b8] sm:$0xff]  ;;  %v3162_v29 = vcombine.low %v298_v15, %v302_v16  ;;  %v3171_v31 = vcombine.high %v306_v25, %v310_v26  ;;  %v3219_v15 = vcombine.high %v354_v9, %v358_v10  ;;  %v362_v16 = vld [vmem:[#allocation5 + $0x950] sm:$0xff] }
 0x151   :  { %v3173_v33 = vcombine.high %v307_v27, %v311_v28  ;;  %v3172_v40 = vcombine.low %v307_v27, %v311_v28  ;;  %v374_v27 = vld [vmem:[#allocation5 + $0x9b0] sm:$0xff]  ;;  %v371_v28 = vld [vmem:[#allocation5 + $0x998] sm:$0xff] }
 0x153   :  { %2710 = vmatpush1.bf16.msra.mxu0 %v3106_v35  ;;  %2833 = vmatpush1.bf16.msra.mxu1 %v3108_v37  ;;  %v318_v35 = vld [vmem:[#allocation5 + $0x7f0] sm:$0xff]  ;;  %v315_v37 = vld [vmem:[#allocation5 + $0x7d8] sm:$0xff] }
 0x154   :  { %2711 = vmatprep.subr.bf16.mxu0 %v3115_v38  ;;  %2834 = vmatprep.subr.bf16.mxu1 %v3117_v39  ;;  %v319_v38 = vld [vmem:[#allocation5 + $0x7f8] sm:$0xff]  ;;  %v3170_v39 = vcombine.low %v306_v25, %v310_v26  ;;  %v3179_v41 = vcombine.high %v314_v34, %v318_v35  ;;  %v370_v26 = vld [vmem:[#allocation5 + $0x990] sm:$0xff] }
 0x155   :  { %v3181_v42 = vcombine.high %v315_v37, %v319_v38  ;;  %v3180_v48 = vcombine.low %v315_v37, %v319_v38  ;;  %v382_v37 = vld [vmem:[#allocation5 + $0x9f0] sm:$0xff]  ;;  %v379_v38 = vld [vmem:[#allocation5 + $0x9d8] sm:$0xff] }
 0x157   :  { %2712 = vmatpush1.bf16.msra.mxu0 %v3114_v44  ;;  %2835 = vmatpush1.bf16.msra.mxu1 %v3116_v45  ;;  %v326_v44 = vld [vmem:[#allocation5 + $0x830] sm:$0xff]  ;;  %v323_v45 = vld [vmem:[#allocation5 + $0x818] sm:$0xff] }
 0x158   :  { %2713 = vmatprep.subr.bf16.mxu0 %v3123_v46  ;;  %2836 = vmatprep.subr.bf16.mxu1 %v3125_v47  ;;  %v327_v46 = vld [vmem:[#allocation5 + $0x838] sm:$0xff]  ;;  %v3178_v47 = vcombine.low %v314_v34, %v318_v35  ;;  %v3187_v49 = vcombine.high %v322_v43, %v326_v44  ;;  %v378_v35 = vld [vmem:[#allocation5 + $0x9d0] sm:$0xff] }
 0x159   :  { %v3189_v50 = vcombine.high %v323_v45, %v327_v46  ;;  %v3188_v56 = vcombine.low %v323_v45, %v327_v46  ;;  %v390_v45 = vld [vmem:[#allocation5 + $0xa30] sm:$0xff]  ;;  %v387_v46 = vld [vmem:[#allocation5 + $0xa18] sm:$0xff] }
 0x15b   :  { %2714 = vmatpush1.bf16.msra.mxu0 %v3122_v52  ;;  %2837 = vmatpush1.bf16.msra.mxu1 %v3124_v53  ;;  %v334_v52 = vld [vmem:[#allocation5 + $0x870] sm:$0xff]  ;;  %v331_v53 = vld [vmem:[#allocation5 + $0x858] sm:$0xff] }
 0x15c   :  { %2715 = vmatprep.subr.bf16.mxu0 %v3131_v54  ;;  %2838 = vmatprep.subr.bf16.mxu1 %v3133_v55  ;;  %v335_v54 = vld [vmem:[#allocation5 + $0x878] sm:$0xff]  ;;  %v3186_v55 = vcombine.low %v322_v43, %v326_v44  ;;  %v3195_v58 = vcombine.high %v330_v51, %v334_v52  ;;  %v386_v44 = vld [vmem:[#allocation5 + $0xa10] sm:$0xff] }
 0x15d   :  { %v3197_v59 = vcombine.high %v331_v53, %v335_v54  ;;  %v3196_v1 = vcombine.low %v331_v53, %v335_v54  ;;  %v398_v53 = vld [vmem:[#allocation5 + $0xa70] sm:$0xff]  ;;  %v395_v54 = vld [vmem:[#allocation5 + $0xa58] sm:$0xff] }
 0x15f   :  { %2716 = vmatpush1.bf16.msra.mxu0 %v3130_v61  ;;  %2839 = vmatpush1.bf16.msra.mxu1 %v3132_v62  ;;  %v342_v61 = vld [vmem:[#allocation5 + $0x8b0] sm:$0xff]  ;;  %v339_v62 = vld [vmem:[#allocation5 + $0x898] sm:$0xff] }
 0x160   :  { %2717 = vmatprep.subr.bf16.mxu0 %v3139_v63  ;;  %2840 = vmatprep.subr.bf16.mxu1 %v3141_v0  ;;  %v343_v63 = vld [vmem:[#allocation5 + $0x8b8] sm:$0xff]  ;;  %v3194_v0 = vcombine.low %v330_v51, %v334_v52  ;;  %v3203_v2 = vcombine.high %v338_v60, %v342_v61  ;;  %v394_v52 = vld [vmem:[#allocation5 + $0xa50] sm:$0xff] }
 0x161   :  { %v3205_v12 = vcombine.high %v339_v62, %v343_v63 }
 0x163   :  { %2718 = vmatpush1.bf16.msra.mxu0 %v3138_v3  ;;  %2841 = vmatpush1.bf16.msra.mxu1 %v3140_v4  ;;  %v350_v3 = vld [vmem:[#allocation5 + $0x8f0] sm:$0xff]  ;;  %v347_v4 = vld [vmem:[#allocation5 + $0x8d8] sm:$0xff] }
 0x164   :  { %2719 = vmatprep.subr.bf16.mxu0 %v3147_v5  ;;  %2842 = vmatprep.subr.bf16.mxu1 %v3149_v6  ;;  %v351_v5 = vld [vmem:[#allocation5 + $0x8f8] sm:$0xff]  ;;  %v3202_v6 = vcombine.low %v338_v60, %v342_v61  ;;  %v3211_v7 = vcombine.high %v346_v57, %v350_v3  ;;  %v402_v61 = vld [vmem:[#allocation5 + $0xa90] sm:$0xff] }
 0x165   :  { %v3213_v8 = vcombine.high %v347_v4, %v351_v5 }
 0x167   :  { %2720 = vmatpush1.bf16.msra.mxu0 %v3146_v22  ;;  %2843 = vmatpush1.bf16.msra.mxu1 %v3148_v11  ;;  %v355_v22 = vld [vmem:[#allocation5 + $0x918] sm:$0xff] }
 0x168   :  { %2721 = vmatprep.subr.bf16.mxu0 %v3155_v13  ;;  %2844 = vmatprep.subr.bf16.mxu1 %v3157_v14  ;;  %v359_v11 = vld [vmem:[#allocation5 + $0x938] sm:$0xff]  ;;  %v3210_v13 = vcombine.low %v346_v57, %v350_v3  ;;  %v3212_v14 = vcombine.low %v347_v4, %v351_v5  ;;  %v410_v3 = vld [vmem:[#allocation5 + $0xad0] sm:$0xff] }
 0x169   :  { %v414_v4 = vld [vmem:[#allocation5 + $0xaf0] sm:$0xff]  ;;  %v411_v5 = vld [vmem:[#allocation5 + $0xad8] sm:$0xff] }
 0x16b   :  { %2722 = vmatpush1.bf16.msra.mxu0 %v3154_v19  ;;  %2845 = vmatpush1.bf16.msra.mxu1 %v3156_v20  ;;  %v367_v19 = vld [vmem:[#allocation5 + $0x978] sm:$0xff]  ;;  %v3218_v20 = vcombine.low %v354_v9, %v358_v10  ;;  %v418_v10 = vld [vmem:[#allocation5 + $0xb10] sm:$0xff] }
 0x16c   :  { %2723 = vmatprep.subr.bf16.mxu0 %v3163_v23  ;;  %2846 = vmatprep.subr.bf16.mxu1 %v3165_v24  ;;  %v3220_v23 = vcombine.low %v355_v22, %v359_v11  ;;  %v3227_v24 = vcombine.high %v362_v16, %v366_v17  ;;  %v3229_v25 = vcombine.high %v363_v18, %v367_v19 }
 0x16f   :  { %2724 = vmatpush1.bf16.msra.mxu0 %v3162_v29  ;;  %2847 = vmatpush1.bf16.msra.mxu1 %v3164_v30  ;;  %v375_v29 = vld [vmem:[#allocation5 + $0x9b8] sm:$0xff]  ;;  %v3226_v30 = vcombine.low %v362_v16, %v366_v17  ;;  %v426_v17 = vld [vmem:[#allocation5 + $0xb50] sm:$0xff] }
 0x170   :  { %2725 = vmatprep.subr.bf16.mxu0 %v3171_v31  ;;  %2848 = vmatprep.subr.bf16.mxu1 %v3173_v33  ;;  %v3228_v31 = vcombine.low %v363_v18, %v367_v19  ;;  %v3235_v33 = vcombine.high %v370_v26, %v374_v27  ;;  %v3237_v34 = vcombine.high %v371_v28, %v375_v29  ;;  %v430_v18 = vld [vmem:[#allocation5 + $0xb70] sm:$0xff]  ;;  %v427_v19 = vld [vmem:[#allocation5 + $0xb58] sm:$0xff] }
 0x173   :  { %2726 = vmatpush1.bf16.msra.mxu0 %v3170_v39  ;;  %2849 = vmatpush1.bf16.msra.mxu1 %v3172_v40  ;;  %v383_v39 = vld [vmem:[#allocation5 + $0x9f8] sm:$0xff]  ;;  %v3234_v40 = vcombine.low %v370_v26, %v374_v27  ;;  %v434_v27 = vld [vmem:[#allocation5 + $0xb90] sm:$0xff] }
 0x174   :  { %2727 = vmatprep.subr.bf16.mxu0 %v3179_v41  ;;  %2850 = vmatprep.subr.bf16.mxu1 %v3181_v42  ;;  %v3236_v41 = vcombine.low %v371_v28, %v375_v29  ;;  %v3243_v42 = vcombine.high %v378_v35, %v382_v37  ;;  %v3245_v43 = vcombine.high %v379_v38, %v383_v39  ;;  %v438_v28 = vld [vmem:[#allocation5 + $0xbb0] sm:$0xff]  ;;  %v435_v29 = vld [vmem:[#allocation5 + $0xb98] sm:$0xff] }
 0x177   :  { %2728 = vmatpush1.bf16.msra.mxu0 %v3178_v47  ;;  %2851 = vmatpush1.bf16.msra.mxu1 %v3180_v48  ;;  %v391_v47 = vld [vmem:[#allocation5 + $0xa38] sm:$0xff]  ;;  %v3242_v48 = vcombine.low %v378_v35, %v382_v37  ;;  %v442_v37 = vld [vmem:[#allocation5 + $0xbd0] sm:$0xff] }
 0x178   :  { %2738 = vmatprep.subr.bf16.mxu0 %v3187_v49  ;;  %2861 = vmatprep.subr.bf16.mxu1 %v3189_v50  ;;  %v3244_v49 = vcombine.low %v379_v38, %v383_v39  ;;  %v3251_v50 = vcombine.high %v386_v44, %v390_v45  ;;  %v3253_v51 = vcombine.high %v387_v46, %v391_v47  ;;  %v446_v38 = vld [vmem:[#allocation5 + $0xbf0] sm:$0xff]  ;;  %v443_v39 = vld [vmem:[#allocation5 + $0xbd8] sm:$0xff] }
 0x17a   :  { %2730 = vmatmul.mubr.bf16.vlgmr.msra.gmra.mrb[4].mxu0 %v3524_v21  ;;  %2853 = vmatmul.mubr.bf16.vlgmr.msra.gmra.mrb[4].mxu1 %v3524_v21  ;;  %v3204_v21 = vcombine.low %v339_v62, %v343_v63  ;;  %v406_v62 = vld [vmem:[#allocation5 + $0xab0] sm:$0xff]  ;;  %v403_v63 = vld [vmem:[#allocation5 + $0xa98] sm:$0xff] }
 0x17b   :  { %2739 = vmatpush1.bf16.msra.mxu0 %v3186_v55  ;;  %2862 = vmatpush1.bf16.msra.mxu1 %v3188_v56  ;;  %v399_v55 = vld [vmem:[#allocation5 + $0xa78] sm:$0xff]  ;;  %v3250_v56 = vcombine.low %v386_v44, %v390_v45  ;;  %v3306_v45 = vcombine.low %v442_v37, %v446_v38 }
 0x17c   :  { %2740 = vmatprep.subr.bf16.mxu0 %v3195_v58  ;;  %2863 = vmatprep.subr.bf16.mxu1 %v3197_v59  ;;  %v3252_v58 = vcombine.low %v387_v46, %v391_v47  ;;  %v3259_v59 = vcombine.high %v394_v52, %v398_v53  ;;  %v3261_v60 = vcombine.high %v395_v54, %v399_v55  ;;  %v450_v47 = vlaneseq }
 0x17d   :  { %2770 = vmatprep.mubr.bf16.mxu0 %v3526_v32  ;;  %2893 = vmatprep.mubr.bf16.mxu1 %v3526_v32  ;;  %v3221_v32 = vcombine.high %v355_v22, %v359_v11  ;;  %v422_v22 = vld [vmem:[#allocation5 + $0xb30] sm:$0xff]  ;;  %v419_v11 = vld [vmem:[#allocation5 + $0xb18] sm:$0xff] }
 0x17f   :  { %2741 = vmatpush1.bf16.msra.mxu0 %v3194_v0  ;;  %2864 = vmatpush1.bf16.msra.mxu1 %v3196_v1  ;;  %v407_v0 = vld [vmem:[#allocation5 + $0xab8] sm:$0xff]  ;;  %v3258_v1 = vcombine.low %v394_v52, %v398_v53 }
 0x180   :  { %2742 = vmatprep.subr.bf16.mxu0 %v3203_v2  ;;  %2865 = vmatprep.subr.bf16.mxu1 %v3205_v12  ;;  %v3260_v2 = vcombine.low %v395_v54, %v399_v55  ;;  %v3267_v12 = vcombine.high %v402_v61, %v406_v62  ;;  %v3269_v57 = vcombine.high %v403_v63, %v407_v0 }
 0x183   :  { %2743 = vmatpush1.bf16.msra.mxu0 %v3202_v6  ;;  %2866 = vmatpush1.bf16.msra.mxu1 %v3204_v21  ;;  %v415_v6 = vld [vmem:[#allocation5 + $0xaf8] sm:$0xff]  ;;  %v3266_v21 = vcombine.low %v402_v61, %v406_v62 }
 0x184   :  { %2744 = vmatprep.subr.bf16.mxu0 %v3211_v7  ;;  %2867 = vmatprep.subr.bf16.mxu1 %v3213_v8  ;;  %v3268_v7 = vcombine.low %v403_v63, %v407_v0  ;;  %v3275_v8 = vcombine.high %v410_v3, %v414_v4  ;;  %v3277_v9 = vcombine.high %v411_v5, %v415_v6 }
 0x187   :  { %2745 = vmatpush1.bf16.msra.mxu0 %v3210_v13  ;;  %2868 = vmatpush1.bf16.msra.mxu1 %v3212_v14  ;;  %v423_v13 = vld [vmem:[#allocation5 + $0xb38] sm:$0xff]  ;;  %v3274_v14 = vcombine.low %v410_v3, %v414_v4 }
 0x188   :  { %2746 = vmatprep.subr.bf16.mxu0 %v3219_v15  ;;  %2869 = vmatprep.subr.bf16.mxu1 %v3221_v32  ;;  %v3276_v15 = vcombine.low %v411_v5, %v415_v6  ;;  %v3283_v32 = vcombine.high %v418_v10, %v422_v22  ;;  %v3285_v16 = vcombine.high %v419_v11, %v423_v13 }
 0x18b   :  { %2747 = vmatpush1.bf16.msra.mxu0 %v3218_v20  ;;  %2870 = vmatpush1.bf16.msra.mxu1 %v3220_v23  ;;  %v431_v20 = vld [vmem:[#allocation5 + $0xb78] sm:$0xff]  ;;  %v3282_v23 = vcombine.low %v418_v10, %v422_v22 }
 0x18c   :  { %2748 = vmatprep.subr.bf16.mxu0 %v3227_v24  ;;  %2871 = vmatprep.subr.bf16.mxu1 %v3229_v25  ;;  %v3284_v24 = vcombine.low %v419_v11, %v423_v13  ;;  %v3291_v25 = vcombine.high %v426_v17, %v430_v18  ;;  %v3293_v26 = vcombine.high %v427_v19, %v431_v20 }
 0x18f   :  { %2749 = vmatpush1.bf16.msra.mxu0 %v3226_v30  ;;  %2872 = vmatpush1.bf16.msra.mxu1 %v3228_v31  ;;  %v439_v30 = vld [vmem:[#allocation5 + $0xbb8] sm:$0xff]  ;;  %v3290_v31 = vcombine.low %v426_v17, %v430_v18 }
 0x190   :  { %2750 = vmatprep.subr.bf16.mxu0 %v3235_v33  ;;  %2873 = vmatprep.subr.bf16.mxu1 %v3237_v34  ;;  %v3292_v33 = vcombine.low %v427_v19, %v431_v20  ;;  %v3299_v34 = vcombine.high %v434_v27, %v438_v28  ;;  %v3301_v35 = vcombine.high %v435_v29, %v439_v30 }
 0x193   :  { %2751 = vmatpush1.bf16.msra.mxu0 %v3234_v40  ;;  %2874 = vmatpush1.bf16.msra.mxu1 %v3236_v41  ;;  %v447_v40 = vld [vmem:[#allocation5 + $0xbf8] sm:$0xff]  ;;  %v3298_v41 = vcombine.low %v434_v27, %v438_v28 }
 0x194   :  { %2752 = vmatprep.subr.bf16.mxu0 %v3243_v42  ;;  %2875 = vmatprep.subr.bf16.mxu1 %v3245_v43  ;;  %v3300_v42 = vcombine.low %v435_v29, %v439_v30  ;;  %v3307_v43 = vcombine.high %v442_v37, %v446_v38  ;;  %v3309_v44 = vcombine.high %v443_v39, %v447_v40 }
 0x195   :  { %v3308_v46 = vcombine.low %v443_v39, %v447_v40 }
 0x197   :  { %2753 = vmatpush1.bf16.msra.mxu0 %v3242_v48  ;;  %2876 = vmatpush1.bf16.msra.mxu1 %v3244_v49  ;;  %v451_v48 = vshrl.u32 %v450_v47, 7 }
 0x198   :  { %2754 = vmatprep.subr.bf16.mxu0 %v3251_v50  ;;  %2877 = vmatprep.subr.bf16.mxu1 %v3253_v51  ;;  %v448_v50 = vld [vmem:[#allocation7] sm:$0xff] }
 0x199   :  { %v452_v49 = vsub.s32 0, %v451_v48  ;;  %v460_v51 = vsub.s32 2, %v451_v48  ;;  %v456_v52 = vsub.s32 1, %v451_v48  ;;  %v464_v53 = vsub.s32 3, %v451_v48 }
 0x19a   :  { %v468_v4 = vsub.s32 4, %v451_v48  ;;  %v476_v5 = vsub.s32 6, %v451_v48  ;;  %v472_v6 = vsub.s32 5, %v451_v48 }
 0x19b   :  { %2755 = vmatpush1.bf16.msra.mxu0 %v3250_v56  ;;  %2878 = vmatpush1.bf16.msra.mxu1 %v3252_v58  ;;  %v453_v54 = vrot.slane %v448_v50, %v452_v49  ;;  %v461_v55 = vrot.slane %v448_v50, %v460_v51  ;;  %v457_v56 = vrot.slane %v448_v50, %v456_v52 }
 0x19c   :  { %2756 = vmatprep.subr.bf16.mxu0 %v3259_v59  ;;  %2879 = vmatprep.subr.bf16.mxu1 %v3261_v60  ;;  %v465_v58 = vrot.slane %v448_v50, %v464_v53 }
 0x19f   :  { %2757 = vmatpush1.bf16.msra.mxu0 %v3258_v1  ;;  %2880 = vmatpush1.bf16.msra.mxu1 %v3260_v2 }
 0x1a0   :  { %2758 = vmatprep.subr.bf16.mxu0 %v3267_v12  ;;  %2881 = vmatprep.subr.bf16.mxu1 %v3269_v57 }
 0x1a3   :  { %2759 = vmatpush1.bf16.msra.mxu0 %v3266_v21  ;;  %2882 = vmatpush1.bf16.msra.mxu1 %v3268_v7  ;;  %v480_v21 = vsub.s32 7, %v451_v48  ;;  %v469_v7 = vrot.slane %v448_v50, %v468_v4 }
 0x1a4   :  { %2760 = vmatprep.subr.bf16.mxu0 %v3275_v8  ;;  %2883 = vmatprep.subr.bf16.mxu1 %v3277_v9  ;;  %v477_v8 = vrot.slane %v448_v50, %v476_v5  ;;  %v473_v9 = vrot.slane %v448_v50, %v472_v6 }
 0x1a5   :  { %v481_v10 = vrot.slane %v448_v50, %v480_v21 }
 0x1a7   :  { %2761 = vmatpush1.bf16.msra.mxu0 %v3274_v14  ;;  %2884 = vmatpush1.bf16.msra.mxu1 %v3276_v15 }
 0x1a8   :  { %2762 = vmatprep.subr.bf16.mxu0 %v3283_v32  ;;  %2885 = vmatprep.subr.bf16.mxu1 %v3285_v16 }
 0x1ab   :  { %2763 = vmatpush1.bf16.msra.mxu0 %v3282_v23  ;;  %2886 = vmatpush1.bf16.msra.mxu1 %v3284_v24 }
 0x1ac   :  { %2764 = vmatprep.subr.bf16.mxu0 %v3291_v25  ;;  %2887 = vmatprep.subr.bf16.mxu1 %v3293_v26 }
 0x1af   :  { %2765 = vmatpush1.bf16.msra.mxu0 %v3290_v31  ;;  %2888 = vmatpush1.bf16.msra.mxu1 %v3292_v33 }
 0x1b0   :  { %2766 = vmatprep.subr.bf16.mxu0 %v3299_v34  ;;  %2889 = vmatprep.subr.bf16.mxu1 %v3301_v35 }
 0x1b3   :  { %2767 = vmatpush1.bf16.msra.mxu0 %v3298_v41  ;;  %2890 = vmatpush1.bf16.msra.mxu1 %v3300_v42 }
 0x1b4   :  { %2768 = vmatprep.subr.bf16.mxu0 %v3307_v43  ;;  %2891 = vmatprep.subr.bf16.mxu1 %v3309_v44 }
 0x1b7   :  { %2769 = vmatpush1.bf16.msra.mxu0 %v3306_v45  ;;  %2892 = vmatpush1.bf16.msra.mxu1 %v3308_v46 }
 0x1ba   :  { %2771 = vmatmul.mubr.bf16.vlgmr.msra.gmra.mrb[4].mxu0 %v3532_v36  ;;  %2894 = vmatmul.mubr.bf16.vlgmr.msra.gmra.mrb[4].mxu1 %v3532_v36 }
 0x1cd   :  { %v2526_v59 = vpop.f32.mrb[0].mxu0  ;;  %v2649_v61 = vpop.f32.mrb[0].mxu1 }
 0x1ce   :  { %v3310_v60 = vadd.f32 %v2526_v59, %v453_v54  ;;  %v2528_v62 = vpop.f32.mrb[1].mxu0  ;;  %v3312_v63 = vadd.f32 %v2649_v61, %v461_v55  ;;  %v2651_v1 = vpop.f32.mrb[1].mxu1 }
 0x1cf   :  { %v3311_v0 = vadd.f32 %v2528_v62, %v457_v56  ;;  %v2530_v2 = vpop.f32.mrb[2].mxu0  ;;  %v3313_v36 = vadd.f32 %v2651_v1, %v465_v58  ;;  %v2653_v12 = vpop.f32.mrb[2].mxu1 }
 0x1d0   :  { %2902 = vst [vmem:[#allocation8] sm:$0xff] %v3310_v60  ;;  %v2531_v57 = vpop.f32.mrb[3].mxu0  ;;  %2904 = vst [vmem:[#allocation8 + $0x10] sm:$0xff] %v3312_v63  ;;  %v2654_v3 = vpop.f32.mrb[3].mxu1 }
 0x1d1   :  { %2903 = vst [vmem:[#allocation8 + $0x8] sm:$0xff] %v3311_v0  ;;  %2905 = vst [vmem:[#allocation8 + $0x18] sm:$0xff] %v3313_v36 }
 0x28d   :  { %v2772_v22 = vpop.f32.mrb[4].mxu0  ;;  %v2895_v13 = vpop.f32.mrb[4].mxu1 }
 0x28e   :  { %v3314_v11 = vadd.f32 %v2772_v22, %v469_v7  ;;  %v2774_v14 = vpop.f32.mrb[5].mxu0  ;;  %v3316_v15 = vadd.f32 %v2895_v13, %v477_v8  ;;  %v2897_v16 = vpop.f32.mrb[5].mxu1 }
 0x28f   :  { %v3315_v32 = vadd.f32 %v2774_v14, %v473_v9  ;;  %v2776_v17 = vpop.f32.mrb[6].mxu0  ;;  %v3317_v18 = vadd.f32 %v2897_v16, %v481_v10  ;;  %v2899_v19 = vpop.f32.mrb[6].mxu1 }
 0x290   :  { %2906 = vst [vmem:[#allocation8 + $0x20] sm:$0xff] %v3314_v11  ;;  %v2777_v20 = vpop.f32.mrb[7].mxu0  ;;  %2908 = vst [vmem:[#allocation8 + $0x30] sm:$0xff] %v3316_v15  ;;  %v2900_v23 = vpop.f32.mrb[7].mxu1 }
 0x291   :  { %2907 = vst [vmem:[#allocation8 + $0x28] sm:$0xff] %v3315_v32  ;;  %2909 = vst [vmem:[#allocation8 + $0x38] sm:$0xff] %v3317_v18 }
 0x292   :  { %3433 = shalt.err (!%p3430_p0)
}
 0x293   :  { %s3434_s25 = scalar_lea.hbm %s3563_s3, 1024 }
 0x294   :  { %p3435_p1 = scmp.ne.s32.totalorder %s3563_s3, %s3434_s25  ;;  %p3438_p2 = scmp.lt.u32.totalorder %s3434_s25, %s3563_s3 }
 0x296   :  { %p3440_p3 = pnand %p3438_p2, %p3435_p1 }
 0x298   :  { %3443 = shalt.err (!%p3440_p3)
}
 0x299   :  { %2919 = dma.vmem_to_hbm [thread:$0]  %s2917_s21, 1024, %s3563_s3, [#allocation4]  }
 0x29a   :  { %3448 = dma.done.wait [#allocation4], 1024  }
 0x29b   :  { %3449 = vsyncadd [#allocation4], 4294966272 }
 0x29c   :  { %2923 = vsyncpa [#allocation3], 1 }
 0x29d   :  { %2924 = vsyncpa [#allocation6], 1 }
 0x29e   :  { %2925 = vsyncpa [#allocation4], 1 }

</bundles_post_ra>
